<compile_context>
chip_gen: v6e
topology: v6e:2x2x1
jax: 0.10.0
libtpu: 0.0.40
codegen_flags: <defaults>
</compile_context>

<pallas_src>
import functools

import jax
import jax.numpy as jnp
from jax.experimental import pallas as pl
from jax.experimental.pallas import tpu as pltpu

BN_EPS = 1e-5       # nn.BatchNorm1d default eps
NORM_EPS = 1e-12    # F.normalize default eps
LANE = 128
SUBLANE = 8
MAX_TK = 1024       # K tile for the encoder reduction (review: 1024-2048)


def _round_up(x, m):
    return (x + m - 1) // m * m


# ---------------- fused Pallas kernel ----------------

def _fused_byol_kernel(
    x1_ref, x2_ref, we_ref, be_ref,
    pw1_ref, pb1_ref, pg_ref, pbt_ref, pw2_ref, pb2_ref,
    qw1_ref, qb1_ref, qg_ref, qbt_ref, qw2_ref, qb2_ref,
    o_ref, acc1_ref, acc2_ref,
    *, b_real, b_pad,
):
    k = pl.program_id(0)

    @pl.when(k == 0)
    def _():
        acc1_ref[...] = jnp.zeros_like(acc1_ref)
        acc2_ref[...] = jnp.zeros_like(acc2_ref)

    # encoder Linear, K-tiled: per-view accumulation (bf16 in, f32 accumulate).
    # The weight tile is loaded once and feeds both views' dots.
    we = we_ref[...]
    acc1_ref[...] += jnp.dot(x1_ref[...], we, preferred_element_type=jnp.float32)
    acc2_ref[...] += jnp.dot(x2_ref[...], we, preferred_element_type=jnp.float32)

    @pl.when(k == pl.num_programs(0) - 1)
    def _():
        inv_b = 1.0 / float(b_real)

        # Row mask only needed when the real batch is smaller than the padded batch.
        if b_real == b_pad:
            mask = None
        else:
            row = jax.lax.broadcasted_iota(jnp.int32, (b_pad, 1), 0)
            mask = (row < b_real).astype(jnp.float32)

        def bn_relu(h, gamma, beta):
            # training-mode BatchNorm1d (biased batch variance) over the REAL rows of
            # ONE view (matches the two separate PyTorch projector/predictor calls).
            if mask is None:
                mean = jnp.sum(h, axis=0, keepdims=True) * inv_b
                d = h - mean
                var = jnp.sum(d * d, axis=0, keepdims=True) * inv_b
            else:
                mean = jnp.sum(h * mask, axis=0, keepdims=True) * inv_b
                d = h - mean
                var = jnp.sum(d * d * mask, axis=0, keepdims=True) * inv_b
            hn = d * jax.lax.rsqrt(var + BN_EPS)
            return jnp.maximum(hn * gamma + beta, 0.0)

        def mlp(x, w1, b1, g, bt, w2, b2):
            # Linear -> BN -> ReLU -> Linear (bf16 MXU inputs, f32 accumulate/elemwise)
            h = jnp.dot(x.astype(jnp.bfloat16), w1,
                        preferred_element_type=jnp.float32) + b1
            h = bn_relu(h, g, bt)
            return jnp.dot(h.astype(jnp.bfloat16), w2,
                           preferred_element_type=jnp.float32) + b2

        # backbone hidden(-2) representation per view
        be = be_ref[...]
        rep1 = jnp.maximum(acc1_ref[...] + be, 0.0)
        rep2 = jnp.maximum(acc2_ref[...] + be, 0.0)

        pw1 = pw1_ref[...]; pb1 = pb1_ref[...]; pg = pg_ref[...]; pbt = pbt_ref[...]
        pw2 = pw2_ref[...]; pb2 = pb2_ref[...]
        proj1 = mlp(rep1, pw1, pb1, pg, pbt, pw2, pb2)
        proj2 = mlp(rep2, pw1, pb1, pg, pbt, pw2, pb2)

        qw1 = qw1_ref[...]; qb1 = qb1_ref[...]; qg = qg_ref[...]; qbt = qbt_ref[...]
        qw2 = qw2_ref[...]; qb2 = qb2_ref[...]
        pred1 = mlp(proj1, qw1, qb1, qg, qbt, qw2, qb2)
        pred2 = mlp(proj2, qw1, qb1, qg, qbt, qw2, qb2)

        def l2n(v):
            ss = jnp.sum(v * v, axis=-1, keepdims=True)
            # == v / max(||v||, eps)  (F.normalize), via EUP rsqrt
            return v * jax.lax.rsqrt(jnp.maximum(ss, NORM_EPS * NORM_EPS))

        # Target projections == stop_gradient(online projections) at this forward
        # (deepcopy target encoder, same inputs): pred_one pairs with proj_two and
        # pred_two with proj_one — static halves, no roll / masked swap needed.
        pn1 = l2n(pred1); pn2 = l2n(pred2)
        tn1 = l2n(proj1); tn2 = l2n(proj2)
        loss1 = 2.0 - 2.0 * jnp.sum(pn1 * tn2, axis=-1, keepdims=True)   # (b_pad, 1)
        loss2 = 2.0 - 2.0 * jnp.sum(pn2 * tn1, axis=-1, keepdims=True)
        row_loss = loss1 + loss2
        if mask is not None:
            row_loss = row_loss * mask
        total = jnp.sum(row_loss, axis=0, keepdims=True) * inv_b          # (1, 1)
        o_ref[...] = total * jnp.ones((1, LANE), jnp.float32)             # lane-dense


# ---------------- spec / budget helpers ----------------

def _spec(shape, index_map, bufs=None):
    """BlockSpec with optional pipeline depth; falls back if the kwarg is absent."""
    if bufs is not None:
        try:
            return pl.BlockSpec(shape, index_map, pipeline_mode=pl.Buffered(bufs))
        except Exception:  # older jax without pipeline_mode / Buffered
            pass
    return pl.BlockSpec(shape, index_map)


def _vmem_limit_bytes(b_pad, tk, f_pad, h_pad, p_pad, stream_bufs):
    nb = stream_bufs if stream_bufs is not None else 2
    stream = nb * (2 * b_pad * tk + tk * f_pad) * 2                      # bf16 x1,x2,we
    resident = ((f_pad * h_pad + 2 * h_pad * p_pad + p_pad * h_pad) * 2  # bf16 weights
                + (f_pad + 6 * h_pad + 2 * p_pad) * 4)                   # f32 biases/BN
    acc = 2 * b_pad * f_pad * 4
    epilogue = 10 * b_pad * max(f_pad, h_pad, p_pad) * 4                 # f32 temporaries
    est = stream + resident + acc + epilogue
    return int(min(100 * 1024 * 1024, max(32 * 1024 * 1024, est * 3 // 2)))


# ---------------- one-time parameter preparation ----------------

def prepare_byol_params(params, batch_size, d_in, max_tk=MAX_TK):
    """Pad + cast weights to their TPU layout ONCE (outside the per-step forward)."""
    enc_w, enc_b = params["encoder"]          # (D_in, FEAT), (1, FEAT)
    proj_p = params["projector"]
    pred_p = params["predictor"]
    feat = enc_w.shape[1]
    hid = proj_p[0].shape[1]
    psz = proj_p[4].shape[1]

    b_pad = _round_up(batch_size, SUBLANE)
    tk = max_tk if d_in >= max_tk else _round_up(d_in, LANE)
    d_pad = _round_up(d_in, tk)
    f_pad = _round_up(feat, LANE)
    h_pad = _round_up(hid, LANE)
    p_pad = _round_up(psz, LANE)

    cfg = dict(b_real=int(batch_size), b_pad=b_pad, d_in=int(d_in), d_pad=d_pad,
               tk=tk, f_pad=f_pad, h_pad=h_pad, p_pad=p_pad)

    def pad2(a, r, c, dtype):
        a = a.astype(dtype)
        return jnp.pad(a, ((0, r - a.shape[0]), (0, c - a.shape[1])))

    def pad_mlp(p, in_pad):
        w1, b1, g, bt, w2, b2 = p
        return (pad2(w1, in_pad, h_pad, jnp.bfloat16),
                pad2(b1, 1, h_pad, jnp.float32),
                pad2(g, 1, h_pad, jnp.float32),
                pad2(bt, 1, h_pad, jnp.float32),
                pad2(w2, h_pad, p_pad, jnp.bfloat16),
                pad2(b2, 1, p_pad, jnp.float32))

    padded = {
        "we": pad2(enc_w, d_pad, f_pad, jnp.bfloat16),
        "be": pad2(enc_b, 1, f_pad, jnp.float32),
        "proj": pad_mlp(proj_p, f_pad),
        "pred": pad_mlp(pred_p, p_pad),
    }
    return padded, cfg


# ---------------- per-step forward (jit this with cfg baked in) ----------------

def _byol_forward_impl(padded, image_one, image_two, *,
                       b_real, b_pad, d_in, d_pad, tk, f_pad, h_pad, p_pad):
    kt = d_pad // tk
    m = 2 * b_pad

    # Activations: cast to bf16 BEFORE padding (2 B/elem copy at most; no concatenate).
    def prep_x(img):
        x = img.reshape(b_real, -1).astype(jnp.bfloat16)
        return jnp.pad(x, ((0, b_pad - b_real), (0, d_pad - d_in)))

    x1 = prep_x(image_one)
    x2 = prep_x(image_two)

    kernel = functools.partial(_fused_byol_kernel, b_real=b_real, b_pad=b_pad)

    stream_bufs = 3 if kt >= 3 else None     # deeper pipeline only when the K loop is deep
    c0 = lambda k: (0, 0)

    in_specs = [
        _spec((b_pad, tk), lambda k: (0, k), stream_bufs),     # x1, K-tiled
        _spec((b_pad, tk), lambda k: (0, k), stream_bufs),     # x2, K-tiled
        _spec((tk, f_pad), lambda k: (k, 0), stream_bufs),     # encoder weight, K-tiled
        _spec((1, f_pad), c0, 1),                              # encoder bias (resident)
        # projector (resident, single-buffered)
        _spec((f_pad, h_pad), c0, 1), _spec((1, h_pad), c0, 1),
        _spec((1, h_pad), c0, 1), _spec((1, h_pad), c0, 1),
        _spec((h_pad, p_pad), c0, 1), _spec((1, p_pad), c0, 1),
        # predictor (resident, single-buffered)
        _spec((p_pad, h_pad), c0, 1), _spec((1, h_pad), c0, 1),
        _spec((1, h_pad), c0, 1), _spec((1, h_pad), c0, 1),
        _spec((h_pad, p_pad), c0, 1), _spec((1, p_pad), c0, 1),
    ]

    flops = (2 * m * d_pad * f_pad
             + 2 * m * (f_pad * h_pad + h_pad * p_pad)
             + 2 * m * (p_pad * h_pad + h_pad * p_pad))
    bytes_accessed = (2 * b_pad * d_pad * 2 * 2                      # x1 + x2 (bf16)
                      + d_pad * f_pad * 2                            # encoder weight
                      + (f_pad * h_pad + 2 * h_pad * p_pad + p_pad * h_pad) * 2
                      + (f_pad + 6 * h_pad + 2 * p_pad) * 4
                      + LANE * 4)
    cost = pl.CostEstimate(flops=flops,
                           transcendentals=4 * h_pad + 2 * p_pad + 4 * m,
                           bytes_accessed=bytes_accessed)

    out = pl.pallas_call(
        kernel,
        out_shape=jax.ShapeDtypeStruct((1, LANE), jnp.float32),
        grid_spec=pltpu.PrefetchScalarGridSpec(
            num_scalar_prefetch=0,
            grid=(kt,),
            in_specs=in_specs,
            out_specs=pl.BlockSpec((1, LANE), lambda k: (0, 0)),
            scratch_shapes=[pltpu.VMEM((b_pad, f_pad), jnp.float32),
                            pltpu.VMEM((b_pad, f_pad), jnp.float32)],
        ),
        compiler_params=pltpu.CompilerParams(
            dimension_semantics=("arbitrary",),        # K is a reduction axis
            vmem_limit_bytes=_vmem_limit_bytes(b_pad, tk, f_pad, h_pad, p_pad,
                                               stream_bufs),
        ),
        cost_estimate=cost,
    )(x1, x2, padded["we"], padded["be"], *padded["proj"], *padded["pred"])
    return out[0, 0]


# ---------------- deterministic parameter init (PyTorch-like) ----------------

def init_linear(key, fan_in, fan_out):
    kw, kb = jax.random.split(key)
    bound = 1.0 / jnp.sqrt(jnp.float32(fan_in))
    w = jax.random.uniform(kw, (fan_in, fan_out), jnp.float32, -bound, bound)
    b = jax.random.uniform(kb, (1, fan_out), jnp.float32, -bound, bound)
    return w, b


def init_mlp(key, dim, projection_size, hidden_size):
    k1, k2 = jax.random.split(key)
    w1, b1 = init_linear(k1, dim, hidden_size)
    gamma = jnp.ones((1, hidden_size), jnp.float32)
    beta = jnp.zeros((1, hidden_size), jnp.float32)
    w2, b2 = init_linear(k2, hidden_size, projection_size)
    return (w1, b1, gamma, beta, w2, b2)


if __name__ == "__main__":
    # small shapes consistent with BYOL.__init__'s dry-run:
    # torch.randn(2, 1, image_size_z, image_size_xy, image_size_xy)
    B, C, Z, XY = 2, 1, 8, 16
    FEAT = 64                    # backbone hidden (representation) dim
    PROJ_SIZE = 32               # projection_size (scaled down from 256)
    PROJ_HID = 64                # projection_hidden_size (scaled down from 4096)
    D_IN = C * Z * XY * XY

    root = jax.random.PRNGKey(0)
    k_img1, k_img2, k_enc, k_proj, k_pred = jax.random.split(root, 5)

    image_one = jax.random.normal(k_img1, (B, C, Z, XY, XY), jnp.float32)
    image_two = jax.random.normal(k_img2, (B, C, Z, XY, XY), jnp.float32)

    params = {
        "encoder": init_linear(k_enc, D_IN, FEAT),
        "projector": init_mlp(k_proj, FEAT, PROJ_SIZE, PROJ_HID),
        "predictor": init_mlp(k_pred, PROJ_SIZE, PROJ_SIZE, PROJ_HID),
    }

    # One-time weight padding / bf16 cast (NOT repeated per training step).
    padded_params, cfg = prepare_byol_params(params, batch_size=B, d_in=D_IN)
    fwd = jax.jit(functools.partial(_byol_forward_impl, **cfg))

    loss = fwd(padded_params, image_one, image_two)
    loss = jax.block_until_ready(loss)
    assert loss.shape == () and bool(jnp.isfinite(loss))
    print("KERNEL_OK")
</pallas_src>

<mosaic_0001>
module attributes {stable_mosaic.version = 11 : i64} {
  func.func @_fused_byol_kernel(%arg0: i32, %arg1: memref<8x1024xbf16, #tpu.memory_space<vmem>>, %arg2: memref<8x1024xbf16, #tpu.memory_space<vmem>>, %arg3: memref<1024x128xbf16, #tpu.memory_space<vmem>>, %arg4: memref<1x128xf32, #tpu.memory_space<vmem>>, %arg5: memref<128x128xbf16, #tpu.memory_space<vmem>>, %arg6: memref<1x128xf32, #tpu.memory_space<vmem>>, %arg7: memref<1x128xf32, #tpu.memory_space<vmem>>, %arg8: memref<1x128xf32, #tpu.memory_space<vmem>>, %arg9: memref<128x128xbf16, #tpu.memory_space<vmem>>, %arg10: memref<1x128xf32, #tpu.memory_space<vmem>>, %arg11: memref<128x128xbf16, #tpu.memory_space<vmem>>, %arg12: memref<1x128xf32, #tpu.memory_space<vmem>>, %arg13: memref<1x128xf32, #tpu.memory_space<vmem>>, %arg14: memref<1x128xf32, #tpu.memory_space<vmem>>, %arg15: memref<128x128xbf16, #tpu.memory_space<vmem>>, %arg16: memref<1x128xf32, #tpu.memory_space<vmem>>, %arg17: memref<1x128xf32, #tpu.memory_space<vmem>>, %arg18: memref<8x128xf32, #tpu.memory_space<vmem>>, %arg19: memref<8x128xf32, #tpu.memory_space<vmem>>) attributes {dimension_semantics = [#tpu.dimension_semantics<arbitrary>], iteration_bounds = array<i64: 2>, scalar_prefetch = 0 : i64, scratch_operands = 2 : i64, tpu.core_type = #tpu.core_type<tc>, window_params = [{transform_indices = @transform_0, window_bounds = array<i64: 8, 1024>}, {transform_indices = @transform_1, window_bounds = array<i64: 8, 1024>}, {transform_indices = @transform_2, window_bounds = array<i64: 1024, 128>}, {pipeline_mode = #tpu.pipeline_mode<synchronous>, transform_indices = @transform_3, window_bounds = array<i64: 1, 128>}, {pipeline_mode = #tpu.pipeline_mode<synchronous>, transform_indices = @transform_4, window_bounds = array<i64: 128, 128>}, {pipeline_mode = #tpu.pipeline_mode<synchronous>, transform_indices = @transform_5, window_bounds = array<i64: 1, 128>}, {pipeline_mode = #tpu.pipeline_mode<synchronous>, transform_indices = @transform_6, window_bounds = array<i64: 1, 128>}, {pipeline_mode = #tpu.pipeline_mode<synchronous>, transform_indices = @transform_7, window_bounds = array<i64: 1, 128>}, {pipeline_mode = #tpu.pipeline_mode<synchronous>, transform_indices = @transform_8, window_bounds = array<i64: 128, 128>}, {pipeline_mode = #tpu.pipeline_mode<synchronous>, transform_indices = @transform_9, window_bounds = array<i64: 1, 128>}, {pipeline_mode = #tpu.pipeline_mode<synchronous>, transform_indices = @transform_10, window_bounds = array<i64: 128, 128>}, {pipeline_mode = #tpu.pipeline_mode<synchronous>, transform_indices = @transform_11, window_bounds = array<i64: 1, 128>}, {pipeline_mode = #tpu.pipeline_mode<synchronous>, transform_indices = @transform_12, window_bounds = array<i64: 1, 128>}, {pipeline_mode = #tpu.pipeline_mode<synchronous>, transform_indices = @transform_13, window_bounds = array<i64: 1, 128>}, {pipeline_mode = #tpu.pipeline_mode<synchronous>, transform_indices = @transform_14, window_bounds = array<i64: 128, 128>}, {pipeline_mode = #tpu.pipeline_mode<synchronous>, transform_indices = @transform_15, window_bounds = array<i64: 1, 128>}, {pipeline_mode = #tpu.pipeline_mode<synchronous>, transform_indices = @transform_16, window_bounds = array<i64: 1, 128>}]} {
    %c0_i32 = arith.constant 0 : i32
    %0 = arith.cmpi eq, %arg0, %c0_i32 : i32
    %1 = arith.extui %0 : i1 to i32
    %c0_i32_0 = arith.constant 0 : i32
    %2 = arith.cmpi ne, %1, %c0_i32_0 : i32
    scf.if %2 {
      %cst_16 = arith.constant 0.000000e+00 : f32
      %17 = vector.broadcast %cst_16 : f32 to vector<8x128xf32>
      %c0_17 = arith.constant 0 : index
      %c0_18 = arith.constant 0 : index
      %18 = vector.load %arg18[%c0_17, %c0_18] : memref<8x128xf32, #tpu.memory_space<vmem>>, vector<8x128xf32>
      tpu.vector_store %arg18[%c0_17, %c0_18], %17 {strides = array<i32>} : memref<8x128xf32, #tpu.memory_space<vmem>>, vector<8x128xf32>,
      %cst_19 = arith.constant 0.000000e+00 : f32
      %19 = vector.broadcast %cst_19 : f32 to vector<8x128xf32>
      %c0_20 = arith.constant 0 : index
      %c0_21 = arith.constant 0 : index
      %20 = vector.load %arg19[%c0_20, %c0_21] : memref<8x128xf32, #tpu.memory_space<vmem>>, vector<8x128xf32>
      tpu.vector_store %arg19[%c0_20, %c0_21], %19 {strides = array<i32>} : memref<8x128xf32, #tpu.memory_space<vmem>>, vector<8x128xf32>,
    } else {
    }
    %c0 = arith.constant 0 : index
    %c0_1 = arith.constant 0 : index
    %3 = vector.load %arg3[%c0, %c0_1] : memref<1024x128xbf16, #tpu.memory_space<vmem>>, vector<1024x128xbf16>
    %c0_2 = arith.constant 0 : index
    %c0_3 = arith.constant 0 : index
    %4 = vector.load %arg18[%c0_2, %c0_3] : memref<8x128xf32, #tpu.memory_space<vmem>>, vector<8x128xf32>
    %c0_4 = arith.constant 0 : index
    %c0_5 = arith.constant 0 : index
    %5 = vector.load %arg1[%c0_4, %c0_5] : memref<8x1024xbf16, #tpu.memory_space<vmem>>, vector<8x1024xbf16>
    %cst = arith.constant dense<0.000000e+00> : vector<8x128xf32>
    %6 = tpu.matmul %5, %3, %cst {dimension_numbers = #tpu.dot_dimension_numbers<[1], [0], [0], [1], [0, 0, 1, 1], [], []>} : vector<8x1024xbf16>, vector<1024x128xbf16>, vector<8x128xf32> -> vector<8x128xf32>
    %7 = arith.addf %4, %6 : vector<8x128xf32>
    %c0_6 = arith.constant 0 : index
    %c0_7 = arith.constant 0 : index
    %8 = vector.load %arg18[%c0_6, %c0_7] : memref<8x128xf32, #tpu.memory_space<vmem>>, vector<8x128xf32>
    tpu.vector_store %arg18[%c0_6, %c0_7], %7 {strides = array<i32>} : memref<8x128xf32, #tpu.memory_space<vmem>>, vector<8x128xf32>,
    %c0_8 = arith.constant 0 : index
    %c0_9 = arith.constant 0 : index
    %9 = vector.load %arg19[%c0_8, %c0_9] : memref<8x128xf32, #tpu.memory_space<vmem>>, vector<8x128xf32>
    %c0_10 = arith.constant 0 : index
    %c0_11 = arith.constant 0 : index
    %10 = vector.load %arg2[%c0_10, %c0_11] : memref<8x1024xbf16, #tpu.memory_space<vmem>>, vector<8x1024xbf16>
    %cst_12 = arith.constant dense<0.000000e+00> : vector<8x128xf32>
    %11 = tpu.matmul %10, %3, %cst_12 {dimension_numbers = #tpu.dot_dimension_numbers<[1], [0], [0], [1], [0, 0, 1, 1], [], []>} : vector<8x1024xbf16>, vector<1024x128xbf16>, vector<8x128xf32> -> vector<8x128xf32>
    %12 = arith.addf %9, %11 : vector<8x128xf32>
    %c0_13 = arith.constant 0 : index
    %c0_14 = arith.constant 0 : index
    %13 = vector.load %arg19[%c0_13, %c0_14] : memref<8x128xf32, #tpu.memory_space<vmem>>, vector<8x128xf32>
    tpu.vector_store %arg19[%c0_13, %c0_14], %12 {strides = array<i32>} : memref<8x128xf32, #tpu.memory_space<vmem>>, vector<8x128xf32>,
    %c1_i32 = arith.constant 1 : i32
    %14 = arith.cmpi eq, %arg0, %c1_i32 : i32
    %15 = arith.extui %14 : i1 to i32
    %c0_i32_15 = arith.constant 0 : i32
    %16 = arith.cmpi ne, %15, %c0_i32_15 : i32
    scf.if %16 {
      %17 = tpu.iota {dimensions = array<i32: 0>} : vector<8x1xi32>
      %c2_i32 = arith.constant 2 : i32
      %18 = vector.broadcast %c2_i32 : i32 to vector<8x1xi32>
      %19 = arith.cmpi slt, %17, %18 : vector<8x1xi32>
      %20 = arith.extui %19 : vector<8x1xi1> to vector<8x1xi32>
      %21 = arith.sitofp %20 : vector<8x1xi32> to vector<8x1xf32>
      %c0_16 = arith.constant 0 : index
      %c0_17 = arith.constant 0 : index
      %22 = vector.load %arg4[%c0_16, %c0_17] : memref<1x128xf32, #tpu.memory_space<vmem>>, vector<1x128xf32>
      %c0_18 = arith.constant 0 : index
      %c0_19 = arith.constant 0 : index
      %23 = vector.load %arg18[%c0_18, %c0_19] : memref<8x128xf32, #tpu.memory_space<vmem>>, vector<8x128xf32>
      %24 = vector.broadcast %22 : vector<1x128xf32> to vector<8x128xf32>
      %25 = arith.addf %23, %24 : vector<8x128xf32>
      %cst_20 = arith.constant 0.000000e+00 : f32
      %26 = vector.broadcast %cst_20 : f32 to vector<8x128xf32>
      %27 = arith.maximumf %25, %26 : vector<8x128xf32>
      %c0_21 = arith.constant 0 : index
      %c0_22 = arith.constant 0 : index
      %28 = vector.load %arg19[%c0_21, %c0_22] : memref<8x128xf32, #tpu.memory_space<vmem>>, vector<8x128xf32>
      %29 = vector.broadcast %22 : vector<1x128xf32> to vector<8x128xf32>
      %30 = arith.addf %28, %29 : vector<8x128xf32>
      %cst_23 = arith.constant 0.000000e+00 : f32
      %31 = vector.broadcast %cst_23 : f32 to vector<8x128xf32>
      %32 = arith.maximumf %30, %31 : vector<8x128xf32>
      %c0_24 = arith.constant 0 : index
      %c0_25 = arith.constant 0 : index
      %33 = vector.load %arg5[%c0_24, %c0_25] : memref<128x128xbf16, #tpu.memory_space<vmem>>, vector<128x128xbf16>
      %c0_26 = arith.constant 0 : index
      %c0_27 = arith.constant 0 : index
      %34 = vector.load %arg6[%c0_26, %c0_27] : memref<1x128xf32, #tpu.memory_space<vmem>>, vector<1x128xf32>
      %c0_28 = arith.constant 0 : index
      %c0_29 = arith.constant 0 : index
      %35 = vector.load %arg7[%c0_28, %c0_29] : memref<1x128xf32, #tpu.memory_space<vmem>>, vector<1x128xf32>
      %c0_30 = arith.constant 0 : index
      %c0_31 = arith.constant 0 : index
      %36 = vector.load %arg8[%c0_30, %c0_31] : memref<1x128xf32, #tpu.memory_space<vmem>>, vector<1x128xf32>
      %c0_32 = arith.constant 0 : index
      %c0_33 = arith.constant 0 : index
      %37 = vector.load %arg9[%c0_32, %c0_33] : memref<128x128xbf16, #tpu.memory_space<vmem>>, vector<128x128xbf16>
      %c0_34 = arith.constant 0 : index
      %c0_35 = arith.constant 0 : index
      %38 = vector.load %arg10[%c0_34, %c0_35] : memref<1x128xf32, #tpu.memory_space<vmem>>, vector<1x128xf32>
      %39 = arith.truncf %27 : vector<8x128xf32> to vector<8x128xbf16>
      %cst_36 = arith.constant dense<0.000000e+00> : vector<8x128xf32>
      %40 = tpu.matmul %39, %33, %cst_36 {dimension_numbers = #tpu.dot_dimension_numbers<[1], [0], [0], [1], [0, 0, 1, 1], [], []>} : vector<8x128xbf16>, vector<128x128xbf16>, vector<8x128xf32> -> vector<8x128xf32>
      %41 = vector.broadcast %34 : vector<1x128xf32> to vector<8x128xf32>
      %42 = arith.addf %40, %41 : vector<8x128xf32>
      %43 = vector.broadcast %21 : vector<8x1xf32> to vector<8x128xf32>
      %44 = arith.mulf %42, %43 : vector<8x128xf32>
      %cst_37 = arith.constant dense<0.000000e+00> : vector<128xf32>
      %45 = vector.multi_reduction <add>, %44, %cst_37 [0] : vector<8x128xf32> to vector<128xf32>
      %46 = vector.shape_cast %45 : vector<128xf32> to vector<1x128xf32>
      %cst_38 = arith.constant 5.000000e-01 : f32
      %47 = vector.broadcast %cst_38 : f32 to vector<1x128xf32>
      %48 = arith.mulf %46, %47 : vector<1x128xf32>
      %49 = vector.broadcast %48 : vector<1x128xf32> to vector<8x128xf32>
      %50 = arith.subf %42, %49 : vector<8x128xf32>
      %51 = arith.mulf %50, %50 : vector<8x128xf32>
      %52 = vector.broadcast %21 : vector<8x1xf32> to vector<8x128xf32>
      %53 = arith.mulf %51, %52 : vector<8x128xf32>
      %cst_39 = arith.constant dense<0.000000e+00> : vector<128xf32>
      %54 = vector.multi_reduction <add>, %53, %cst_39 [0] : vector<8x128xf32> to vector<128xf32>
      %55 = vector.shape_cast %54 : vector<128xf32> to vector<1x128xf32>
      %cst_40 = arith.constant 5.000000e-01 : f32
      %56 = vector.broadcast %cst_40 : f32 to vector<1x128xf32>
      %57 = arith.mulf %55, %56 : vector<1x128xf32>
      %cst_41 = arith.constant 9.99999974E-6 : f32
      %58 = vector.broadcast %cst_41 : f32 to vector<1x128xf32>
      %59 = arith.addf %57, %58 : vector<1x128xf32>
      %60 = math.rsqrt %59 : vector<1x128xf32>
      %61 = vector.broadcast %60 : vector<1x128xf32> to vector<8x128xf32>
      %62 = arith.mulf %50, %61 : vector<8x128xf32>
      %63 = vector.broadcast %35 : vector<1x128xf32> to vector<8x128xf32>
      %64 = arith.mulf %62, %63 : vector<8x128xf32>
      %65 = vector.broadcast %36 : vector<1x128xf32> to vector<8x128xf32>
      %66 = arith.addf %64, %65 : vector<8x128xf32>
      %cst_42 = arith.constant 0.000000e+00 : f32
      %67 = vector.broadcast %cst_42 : f32 to vector<8x128xf32>
      %68 = arith.maximumf %66, %67 : vector<8x128xf32>
      %69 = arith.truncf %68 : vector<8x128xf32> to vector<8x128xbf16>
      %cst_43 = arith.constant dense<0.000000e+00> : vector<8x128xf32>
      %70 = tpu.matmul %69, %37, %cst_43 {dimension_numbers = #tpu.dot_dimension_numbers<[1], [0], [0], [1], [0, 0, 1, 1], [], []>} : vector<8x128xbf16>, vector<128x128xbf16>, vector<8x128xf32> -> vector<8x128xf32>
      %71 = vector.broadcast %38 : vector<1x128xf32> to vector<8x128xf32>
      %72 = arith.addf %70, %71 : vector<8x128xf32>
      %73 = arith.truncf %32 : vector<8x128xf32> to vector<8x128xbf16>
      %cst_44 = arith.constant dense<0.000000e+00> : vector<8x128xf32>
      %74 = tpu.matmul %73, %33, %cst_44 {dimension_numbers = #tpu.dot_dimension_numbers<[1], [0], [0], [1], [0, 0, 1, 1], [], []>} : vector<8x128xbf16>, vector<128x128xbf16>, vector<8x128xf32> -> vector<8x128xf32>
      %75 = vector.broadcast %34 : vector<1x128xf32> to vector<8x128xf32>
      %76 = arith.addf %74, %75 : vector<8x128xf32>
      %77 = vector.broadcast %21 : vector<8x1xf32> to vector<8x128xf32>
      %78 = arith.mulf %76, %77 : vector<8x128xf32>
      %cst_45 = arith.constant dense<0.000000e+00> : vector<128xf32>
      %79 = vector.multi_reduction <add>, %78, %cst_45 [0] : vector<8x128xf32> to vector<128xf32>
      %80 = vector.shape_cast %79 : vector<128xf32> to vector<1x128xf32>
      %cst_46 = arith.constant 5.000000e-01 : f32
      %81 = vector.broadcast %cst_46 : f32 to vector<1x128xf32>
      %82 = arith.mulf %80, %81 : vector<1x128xf32>
      %83 = vector.broadcast %82 : vector<1x128xf32> to vector<8x128xf32>
      %84 = arith.subf %76, %83 : vector<8x128xf32>
      %85 = arith.mulf %84, %84 : vector<8x128xf32>
      %86 = vector.broadcast %21 : vector<8x1xf32> to vector<8x128xf32>
      %87 = arith.mulf %85, %86 : vector<8x128xf32>
      %cst_47 = arith.constant dense<0.000000e+00> : vector<128xf32>
      %88 = vector.multi_reduction <add>, %87, %cst_47 [0] : vector<8x128xf32> to vector<128xf32>
      %89 = vector.shape_cast %88 : vector<128xf32> to vector<1x128xf32>
      %cst_48 = arith.constant 5.000000e-01 : f32
      %90 = vector.broadcast %cst_48 : f32 to vector<1x128xf32>
      %91 = arith.mulf %89, %90 : vector<1x128xf32>
      %cst_49 = arith.constant 9.99999974E-6 : f32
      %92 = vector.broadcast %cst_49 : f32 to vector<1x128xf32>
      %93 = arith.addf %91, %92 : vector<1x128xf32>
      %94 = math.rsqrt %93 : vector<1x128xf32>
      %95 = vector.broadcast %94 : vector<1x128xf32> to vector<8x128xf32>
      %96 = arith.mulf %84, %95 : vector<8x128xf32>
      %97 = vector.broadcast %35 : vector<1x128xf32> to vector<8x128xf32>
      %98 = arith.mulf %96, %97 : vector<8x128xf32>
      %99 = vector.broadcast %36 : vector<1x128xf32> to vector<8x128xf32>
      %100 = arith.addf %98, %99 : vector<8x128xf32>
      %cst_50 = arith.constant 0.000000e+00 : f32
      %101 = vector.broadcast %cst_50 : f32 to vector<8x128xf32>
      %102 = arith.maximumf %100, %101 : vector<8x128xf32>
      %103 = arith.truncf %102 : vector<8x128xf32> to vector<8x128xbf16>
      %cst_51 = arith.constant dense<0.000000e+00> : vector<8x128xf32>
      %104 = tpu.matmul %103, %37, %cst_51 {dimension_numbers = #tpu.dot_dimension_numbers<[1], [0], [0], [1], [0, 0, 1, 1], [], []>} : vector<8x128xbf16>, vector<128x128xbf16>, vector<8x128xf32> -> vector<8x128xf32>
      %105 = vector.broadcast %38 : vector<1x128xf32> to vector<8x128xf32>
      %106 = arith.addf %104, %105 : vector<8x128xf32>
      %c0_52 = arith.constant 0 : index
      %c0_53 = arith.constant 0 : index
      %107 = vector.load %arg11[%c0_52, %c0_53] : memref<128x128xbf16, #tpu.memory_space<vmem>>, vector<128x128xbf16>
      %c0_54 = arith.constant 0 : index
      %c0_55 = arith.constant 0 : index
      %108 = vector.load %arg12[%c0_54, %c0_55] : memref<1x128xf32, #tpu.memory_space<vmem>>, vector<1x128xf32>
      %c0_56 = arith.constant 0 : index
      %c0_57 = arith.constant 0 : index
      %109 = vector.load %arg13[%c0_56, %c0_57] : memref<1x128xf32, #tpu.memory_space<vmem>>, vector<1x128xf32>
      %c0_58 = arith.constant 0 : index
      %c0_59 = arith.constant 0 : index
      %110 = vector.load %arg14[%c0_58, %c0_59] : memref<1x128xf32, #tpu.memory_space<vmem>>, vector<1x128xf32>
      %c0_60 = arith.constant 0 : index
      %c0_61 = arith.constant 0 : index
      %111 = vector.load %arg15[%c0_60, %c0_61] : memref<128x128xbf16, #tpu.memory_space<vmem>>, vector<128x128xbf16>
      %c0_62 = arith.constant 0 : index
      %c0_63 = arith.constant 0 : index
      %112 = vector.load %arg16[%c0_62, %c0_63] : memref<1x128xf32, #tpu.memory_space<vmem>>, vector<1x128xf32>
      %113 = arith.truncf %72 : vector<8x128xf32> to vector<8x128xbf16>
      %cst_64 = arith.constant dense<0.000000e+00> : vector<8x128xf32>
      %114 = tpu.matmul %113, %107, %cst_64 {dimension_numbers = #tpu.dot_dimension_numbers<[1], [0], [0], [1], [0, 0, 1, 1], [], []>} : vector<8x128xbf16>, vector<128x128xbf16>, vector<8x128xf32> -> vector<8x128xf32>
      %115 = vector.broadcast %108 : vector<1x128xf32> to vector<8x128xf32>
      %116 = arith.addf %114, %115 : vector<8x128xf32>
      %117 = vector.broadcast %21 : vector<8x1xf32> to vector<8x128xf32>
      %118 = arith.mulf %116, %117 : vector<8x128xf32>
      %cst_65 = arith.constant dense<0.000000e+00> : vector<128xf32>
      %119 = vector.multi_reduction <add>, %118, %cst_65 [0] : vector<8x128xf32> to vector<128xf32>
      %120 = vector.shape_cast %119 : vector<128xf32> to vector<1x128xf32>
      %cst_66 = arith.constant 5.000000e-01 : f32
      %121 = vector.broadcast %cst_66 : f32 to vector<1x128xf32>
      %122 = arith.mulf %120, %121 : vector<1x128xf32>
      %123 = vector.broadcast %122 : vector<1x128xf32> to vector<8x128xf32>
      %124 = arith.subf %116, %123 : vector<8x128xf32>
      %125 = arith.mulf %124, %124 : vector<8x128xf32>
      %126 = vector.broadcast %21 : vector<8x1xf32> to vector<8x128xf32>
      %127 = arith.mulf %125, %126 : vector<8x128xf32>
      %cst_67 = arith.constant dense<0.000000e+00> : vector<128xf32>
      %128 = vector.multi_reduction <add>, %127, %cst_67 [0] : vector<8x128xf32> to vector<128xf32>
      %129 = vector.shape_cast %128 : vector<128xf32> to vector<1x128xf32>
      %cst_68 = arith.constant 5.000000e-01 : f32
      %130 = vector.broadcast %cst_68 : f32 to vector<1x128xf32>
      %131 = arith.mulf %129, %130 : vector<1x128xf32>
      %cst_69 = arith.constant 9.99999974E-6 : f32
      %132 = vector.broadcast %cst_69 : f32 to vector<1x128xf32>
      %133 = arith.addf %131, %132 : vector<1x128xf32>
      %134 = math.rsqrt %133 : vector<1x128xf32>
      %135 = vector.broadcast %134 : vector<1x128xf32> to vector<8x128xf32>
      %136 = arith.mulf %124, %135 : vector<8x128xf32>
      %137 = vector.broadcast %109 : vector<1x128xf32> to vector<8x128xf32>
      %138 = arith.mulf %136, %137 : vector<8x128xf32>
      %139 = vector.broadcast %110 : vector<1x128xf32> to vector<8x128xf32>
      %140 = arith.addf %138, %139 : vector<8x128xf32>
      %cst_70 = arith.constant 0.000000e+00 : f32
      %141 = vector.broadcast %cst_70 : f32 to vector<8x128xf32>
      %142 = arith.maximumf %140, %141 : vector<8x128xf32>
      %143 = arith.truncf %142 : vector<8x128xf32> to vector<8x128xbf16>
      %cst_71 = arith.constant dense<0.000000e+00> : vector<8x128xf32>
      %144 = tpu.matmul %143, %111, %cst_71 {dimension_numbers = #tpu.dot_dimension_numbers<[1], [0], [0], [1], [0, 0, 1, 1], [], []>} : vector<8x128xbf16>, vector<128x128xbf16>, vector<8x128xf32> -> vector<8x128xf32>
      %145 = vector.broadcast %112 : vector<1x128xf32> to vector<8x128xf32>
      %146 = arith.addf %144, %145 : vector<8x128xf32>
      %147 = arith.truncf %106 : vector<8x128xf32> to vector<8x128xbf16>
      %cst_72 = arith.constant dense<0.000000e+00> : vector<8x128xf32>
      %148 = tpu.matmul %147, %107, %cst_72 {dimension_numbers = #tpu.dot_dimension_numbers<[1], [0], [0], [1], [0, 0, 1, 1], [], []>} : vector<8x128xbf16>, vector<128x128xbf16>, vector<8x128xf32> -> vector<8x128xf32>
      %149 = vector.broadcast %108 : vector<1x128xf32> to vector<8x128xf32>
      %150 = arith.addf %148, %149 : vector<8x128xf32>
      %151 = vector.broadcast %21 : vector<8x1xf32> to vector<8x128xf32>
      %152 = arith.mulf %150, %151 : vector<8x128xf32>
      %cst_73 = arith.constant dense<0.000000e+00> : vector<128xf32>
      %153 = vector.multi_reduction <add>, %152, %cst_73 [0] : vector<8x128xf32> to vector<128xf32>
      %154 = vector.shape_cast %153 : vector<128xf32> to vector<1x128xf32>
      %cst_74 = arith.constant 5.000000e-01 : f32
      %155 = vector.broadcast %cst_74 : f32 to vector<1x128xf32>
      %156 = arith.mulf %154, %155 : vector<1x128xf32>
      %157 = vector.broadcast %156 : vector<1x128xf32> to vector<8x128xf32>
      %158 = arith.subf %150, %157 : vector<8x128xf32>
      %159 = arith.mulf %158, %158 : vector<8x128xf32>
      %160 = vector.broadcast %21 : vector<8x1xf32> to vector<8x128xf32>
      %161 = arith.mulf %159, %160 : vector<8x128xf32>
      %cst_75 = arith.constant dense<0.000000e+00> : vector<128xf32>
      %162 = vector.multi_reduction <add>, %161, %cst_75 [0] : vector<8x128xf32> to vector<128xf32>
      %163 = vector.shape_cast %162 : vector<128xf32> to vector<1x128xf32>
      %cst_76 = arith.constant 5.000000e-01 : f32
      %164 = vector.broadcast %cst_76 : f32 to vector<1x128xf32>
      %165 = arith.mulf %163, %164 : vector<1x128xf32>
      %cst_77 = arith.constant 9.99999974E-6 : f32
      %166 = vector.broadcast %cst_77 : f32 to vector<1x128xf32>
      %167 = arith.addf %165, %166 : vector<1x128xf32>
      %168 = math.rsqrt %167 : vector<1x128xf32>
      %169 = vector.broadcast %168 : vector<1x128xf32> to vector<8x128xf32>
      %170 = arith.mulf %158, %169 : vector<8x128xf32>
      %171 = vector.broadcast %109 : vector<1x128xf32> to vector<8x128xf32>
      %172 = arith.mulf %170, %171 : vector<8x128xf32>
      %173 = vector.broadcast %110 : vector<1x128xf32> to vector<8x128xf32>
      %174 = arith.addf %172, %173 : vector<8x128xf32>
      %cst_78 = arith.constant 0.000000e+00 : f32
      %175 = vector.broadcast %cst_78 : f32 to vector<8x128xf32>
      %176 = arith.maximumf %174, %175 : vector<8x128xf32>
      %177 = arith.truncf %176 : vector<8x128xf32> to vector<8x128xbf16>
      %cst_79 = arith.constant dense<0.000000e+00> : vector<8x128xf32>
      %178 = tpu.matmul %177, %111, %cst_79 {dimension_numbers = #tpu.dot_dimension_numbers<[1], [0], [0], [1], [0, 0, 1, 1], [], []>} : vector<8x128xbf16>, vector<128x128xbf16>, vector<8x128xf32> -> vector<8x128xf32>
      %179 = vector.broadcast %112 : vector<1x128xf32> to vector<8x128xf32>
      %180 = arith.addf %178, %179 : vector<8x128xf32>
      %181 = arith.mulf %146, %146 : vector<8x128xf32>
      %cst_80 = arith.constant dense<0.000000e+00> : vector<8xf32>
      %182 = vector.multi_reduction <add>, %181, %cst_80 [1] : vector<8x128xf32> to vector<8xf32>
      %183 = vector.shape_cast %182 : vector<8xf32> to vector<8x1xf32>
      %cst_81 = arith.constant 1.000000e-24 : f32
      %184 = vector.broadcast %cst_81 : f32 to vector<8x1xf32>
      %185 = arith.maximumf %183, %184 : vector<8x1xf32>
      %186 = math.rsqrt %185 : vector<8x1xf32>
      %187 = vector.broadcast %186 : vector<8x1xf32> to vector<8x128xf32>
      %188 = arith.mulf %146, %187 : vector<8x128xf32>
      %189 = arith.mulf %180, %180 : vector<8x128xf32>
      %cst_82 = arith.constant dense<0.000000e+00> : vector<8xf32>
      %190 = vector.multi_reduction <add>, %189, %cst_82 [1] : vector<8x128xf32> to vector<8xf32>
      %191 = vector.shape_cast %190 : vector<8xf32> to vector<8x1xf32>
      %cst_83 = arith.constant 1.000000e-24 : f32
      %192 = vector.broadcast %cst_83 : f32 to vector<8x1xf32>
      %193 = arith.maximumf %191, %192 : vector<8x1xf32>
      %194 = math.rsqrt %193 : vector<8x1xf32>
      %195 = vector.broadcast %194 : vector<8x1xf32> to vector<8x128xf32>
      %196 = arith.mulf %180, %195 : vector<8x128xf32>
      %197 = arith.mulf %72, %72 : vector<8x128xf32>
      %cst_84 = arith.constant dense<0.000000e+00> : vector<8xf32>
      %198 = vector.multi_reduction <add>, %197, %cst_84 [1] : vector<8x128xf32> to vector<8xf32>
      %199 = vector.shape_cast %198 : vector<8xf32> to vector<8x1xf32>
      %cst_85 = arith.constant 1.000000e-24 : f32
      %200 = vector.broadcast %cst_85 : f32 to vector<8x1xf32>
      %201 = arith.maximumf %199, %200 : vector<8x1xf32>
      %202 = math.rsqrt %201 : vector<8x1xf32>
      %203 = vector.broadcast %202 : vector<8x1xf32> to vector<8x128xf32>
      %204 = arith.mulf %72, %203 : vector<8x128xf32>
      %205 = arith.mulf %106, %106 : vector<8x128xf32>
      %cst_86 = arith.constant dense<0.000000e+00> : vector<8xf32>
      %206 = vector.multi_reduction <add>, %205, %cst_86 [1] : vector<8x128xf32> to vector<8xf32>
      %207 = vector.shape_cast %206 : vector<8xf32> to vector<8x1xf32>
      %cst_87 = arith.constant 1.000000e-24 : f32
      %208 = vector.broadcast %cst_87 : f32 to vector<8x1xf32>
      %209 = arith.maximumf %207, %208 : vector<8x1xf32>
      %210 = math.rsqrt %209 : vector<8x1xf32>
      %211 = vector.broadcast %210 : vector<8x1xf32> to vector<8x128xf32>
      %212 = arith.mulf %106, %211 : vector<8x128xf32>
      %213 = arith.mulf %188, %212 : vector<8x128xf32>
      %cst_88 = arith.constant dense<0.000000e+00> : vector<8xf32>
      %214 = vector.multi_reduction <add>, %213, %cst_88 [1] : vector<8x128xf32> to vector<8xf32>
      %215 = vector.shape_cast %214 : vector<8xf32> to vector<8x1xf32>
      %cst_89 = arith.constant 2.000000e+00 : f32
      %216 = vector.broadcast %cst_89 : f32 to vector<8x1xf32>
      %217 = arith.mulf %216, %215 : vector<8x1xf32>
      %cst_90 = arith.constant 2.000000e+00 : f32
      %218 = vector.broadcast %cst_90 : f32 to vector<8x1xf32>
      %219 = arith.subf %218, %217 : vector<8x1xf32>
      %220 = arith.mulf %196, %204 : vector<8x128xf32>
      %cst_91 = arith.constant dense<0.000000e+00> : vector<8xf32>
      %221 = vector.multi_reduction <add>, %220, %cst_91 [1] : vector<8x128xf32> to vector<8xf32>
      %222 = vector.shape_cast %221 : vector<8xf32> to vector<8x1xf32>
      %cst_92 = arith.constant 2.000000e+00 : f32
      %223 = vector.broadcast %cst_92 : f32 to vector<8x1xf32>
      %224 = arith.mulf %223, %222 : vector<8x1xf32>
      %cst_93 = arith.constant 2.000000e+00 : f32
      %225 = vector.broadcast %cst_93 : f32 to vector<8x1xf32>
      %226 = arith.subf %225, %224 : vector<8x1xf32>
      %227 = arith.addf %219, %226 : vector<8x1xf32>
      %228 = arith.mulf %227, %21 : vector<8x1xf32>
      %cst_94 = arith.constant dense<0.000000e+00> : vector<1xf32>
      %229 = vector.multi_reduction <add>, %228, %cst_94 [0] : vector<8x1xf32> to vector<1xf32>
      %230 = vector.shape_cast %229 : vector<1xf32> to vector<1x1xf32>
      %cst_95 = arith.constant 5.000000e-01 : f32
      %231 = vector.broadcast %cst_95 : f32 to vector<1x1xf32>
      %232 = arith.mulf %230, %231 : vector<1x1xf32>
      %cst_96 = arith.constant 1.000000e+00 : f32
      %233 = vector.broadcast %cst_96 : f32 to vector<1x128xf32>
      %234 = vector.broadcast %232 : vector<1x1xf32> to vector<1x128xf32>
      %235 = arith.mulf %234, %233 : vector<1x128xf32>
      %c0_97 = arith.constant 0 : index
      %c0_98 = arith.constant 0 : index
      %236 = vector.load %arg17[%c0_97, %c0_98] : memref<1x128xf32, #tpu.memory_space<vmem>>, vector<1x128xf32>
      tpu.vector_store %arg17[%c0_97, %c0_98], %235 {strides = array<i32>} : memref<1x128xf32, #tpu.memory_space<vmem>>, vector<1x128xf32>,
    } else {
    }
    return
  }
  func.func @transform_0(%arg0: i32) -> (i32, i32) {
    %c0_i32 = arith.constant 0 : i32
    %c0_i32_0 = arith.constant 0 : i32
    return %c0_i32, %arg0 : i32, i32
  }
  func.func @transform_1(%arg0: i32) -> (i32, i32) {
    %c0_i32 = arith.constant 0 : i32
    %c0_i32_0 = arith.constant 0 : i32
    return %c0_i32, %arg0 : i32, i32
  }
  func.func @transform_2(%arg0: i32) -> (i32, i32) {
    %c0_i32 = arith.constant 0 : i32
    %c0_i32_0 = arith.constant 0 : i32
    return %arg0, %c0_i32 : i32, i32
  }
  func.func @transform_3(%arg0: i32) -> (i32, i32) {
    %c0_i32 = arith.constant 0 : i32
    %c0_i32_0 = arith.constant 0 : i32
    %c0_i32_1 = arith.constant 0 : i32
    return %c0_i32, %c0_i32_0 : i32, i32
  }
  func.func @transform_4(%arg0: i32) -> (i32, i32) {
    %c0_i32 = arith.constant 0 : i32
    %c0_i32_0 = arith.constant 0 : i32
    %c0_i32_1 = arith.constant 0 : i32
    return %c0_i32, %c0_i32_0 : i32, i32
  }
  func.func @transform_5(%arg0: i32) -> (i32, i32) {
    %c0_i32 = arith.constant 0 : i32
    %c0_i32_0 = arith.constant 0 : i32
    %c0_i32_1 = arith.constant 0 : i32
    return %c0_i32, %c0_i32_0 : i32, i32
  }
  func.func @transform_6(%arg0: i32) -> (i32, i32) {
    %c0_i32 = arith.constant 0 : i32
    %c0_i32_0 = arith.constant 0 : i32
    %c0_i32_1 = arith.constant 0 : i32
    return %c0_i32, %c0_i32_0 : i32, i32
  }
  func.func @transform_7(%arg0: i32) -> (i32, i32) {
    %c0_i32 = arith.constant 0 : i32
    %c0_i32_0 = arith.constant 0 : i32
    %c0_i32_1 = arith.constant 0 : i32
    return %c0_i32, %c0_i32_0 : i32, i32
  }
  func.func @transform_8(%arg0: i32) -> (i32, i32) {
    %c0_i32 = arith.constant 0 : i32
    %c0_i32_0 = arith.constant 0 : i32
    %c0_i32_1 = arith.constant 0 : i32
    return %c0_i32, %c0_i32_0 : i32, i32
  }
  func.func @transform_9(%arg0: i32) -> (i32, i32) {
    %c0_i32 = arith.constant 0 : i32
    %c0_i32_0 = arith.constant 0 : i32
    %c0_i32_1 = arith.constant 0 : i32
    return %c0_i32, %c0_i32_0 : i32, i32
  }
  func.func @transform_10(%arg0: i32) -> (i32, i32) {
    %c0_i32 = arith.constant 0 : i32
    %c0_i32_0 = arith.constant 0 : i32
    %c0_i32_1 = arith.constant 0 : i32
    return %c0_i32, %c0_i32_0 : i32, i32
  }
  func.func @transform_11(%arg0: i32) -> (i32, i32) {
    %c0_i32 = arith.constant 0 : i32
    %c0_i32_0 = arith.constant 0 : i32
    %c0_i32_1 = arith.constant 0 : i32
    return %c0_i32, %c0_i32_0 : i32, i32
  }
  func.func @transform_12(%arg0: i32) -> (i32, i32) {
    %c0_i32 = arith.constant 0 : i32
    %c0_i32_0 = arith.constant 0 : i32
    %c0_i32_1 = arith.constant 0 : i32
    return %c0_i32, %c0_i32_0 : i32, i32
  }
  func.func @transform_13(%arg0: i32) -> (i32, i32) {
    %c0_i32 = arith.constant 0 : i32
    %c0_i32_0 = arith.constant 0 : i32
    %c0_i32_1 = arith.constant 0 : i32
    return %c0_i32, %c0_i32_0 : i32, i32
  }
  func.func @transform_14(%arg0: i32) -> (i32, i32) {
    %c0_i32 = arith.constant 0 : i32
    %c0_i32_0 = arith.constant 0 : i32
    %c0_i32_1 = arith.constant 0 : i32
    return %c0_i32, %c0_i32_0 : i32, i32
  }
  func.func @transform_15(%arg0: i32) -> (i32, i32) {
    %c0_i32 = arith.constant 0 : i32
    %c0_i32_0 = arith.constant 0 : i32
    %c0_i32_1 = arith.constant 0 : i32
    return %c0_i32, %c0_i32_0 : i32, i32
  }
  func.func @transform_16(%arg0: i32) -> (i32, i32) {
    %c0_i32 = arith.constant 0 : i32
    %c0_i32_0 = arith.constant 0 : i32
    %c0_i32_1 = arith.constant 0 : i32
    return %c0_i32, %c0_i32_0 : i32, i32
  }
}

</mosaic_0001>

<bundles_post_ra>
// kernel: _byol_forward_impl.1
= control target key start
LH: loop header
LB: loop body
LE: loop exit
PB: predicated region body
PF: predicated region fallthrough
CT: control target
= control target key end

     0   :  { %s3916_s0 = inlined_call_operand.vmem [shape: bf16[8,2048], index: 0, kind: input, shape index: {}]   ;;  %s3917_s1 = inlined_call_operand.vmem [shape: bf16[8,2048], index: 1, kind: input, shape index: {}]   ;;  %s3918_s2 = inlined_call_operand.vmem [shape: bf16[2048,128], index: 2, kind: input, shape index: {}]   ;;  %s3919_s3 = inlined_call_operand.vmem [shape: f32[1,128], index: 3, kind: input, shape index: {}]   ;;  %s3920_s4 = inlined_call_operand.vmem [shape: bf16[128,128], index: 4, kind: input, shape index: {}]   ;;  %s3921_s5 = inlined_call_operand.vmem [shape: f32[1,128], index: 5, kind: input, shape index: {}]   ;;  %s3922_s6 = inlined_call_operand.vmem [shape: f32[1,128], index: 6, kind: input, shape index: {}]   ;;  %s3923_s7 = inlined_call_operand.vmem [shape: f32[1,128], index: 7, kind: input, shape index: {}]   ;;  %s3924_s8 = inlined_call_operand.vmem [shape: bf16[128,128], index: 8, kind: input, shape index: {}]   ;;  %s3925_s9 = inlined_call_operand.vmem [shape: f32[1,128], index: 9, kind: input, shape index: {}]   ;;  %s3926_s10 = inlined_call_operand.vmem [shape: bf16[128,128], index: 10, kind: input, shape index: {}]   ;;  %s3927_s11 = inlined_call_operand.vmem [shape: f32[1,128], index: 11, kind: input, shape index: {}]   ;;  %s3928_s12 = inlined_call_operand.vmem [shape: f32[1,128], index: 12, kind: input, shape index: {}]   ;;  %s3929_s13 = inlined_call_operand.vmem [shape: f32[1,128], index: 13, kind: input, shape index: {}]   ;;  %s3930_s14 = inlined_call_operand.hbm [shape: bf16[128,128], index: 14, kind: input, shape index: {}]   ;;  %s3931_s15 = inlined_call_operand.vmem [shape: f32[1,128], index: 15, kind: input, shape index: {}]   ;;  %s3932_s16 = inlined_call_operand.hbm [shape: f32[1,128], index: 16, kind: output, shape index: {}]  }
   0x1   :  { %3943 = sst [smem:[#allocation20_spill]] %s3916_s0 }
   0x2   :  { %3944 = sst [smem:[#allocation21_spill]] %s3930_s14 }
   0x3   :  { %21 = vsyncpa [#allocation5], 0 }
   0x4   :  { %22 = vsyncpa [#allocation6], 0  ;;  %s3227_s21 = smov 0  }
   0x5 LB: > { %s3233_s22 = sadd.s32 4294967295, %s3133_s21   ;;  %p2363_p0 = scmp.ge.s32.totalorder %s3133_s21, 1  ;;  %s3133_s21 = sphi %s3227_s21, %s28_s21  }
   0x6   : > { %p405_p1 = scmp.lt.s32.totalorder %s3133_s21, 3  ;;  %s3135_s23 = smov [#allocation4]  }
   0x7   : > { %s450_s24 = sshll.u32 %s3135_s23, 4  ;;  %p2922_p4 = scmp.eq.s32.totalorder %s3233_s22, 0  ;;  %s451_s24 = int_to_ptr.vmem [resolvable:$true] %s450_s24 }
   0x8   : > { %p3238_p3 = pnand %p2363_p0, %p405_p1  ;;  %s3080_s26 = scalar_lea.vmem %s451_s24, 1024 }
   0x9   : > { %p3081_p8 = scmp.ne.s32.totalorder %s451_s24, %s3080_s26  ;;  %p3088_p11 = scmp.lt.s32.totalorder %s451_s24, %s451_s24 }
   0xa   : > { %p2918_p5 = pneg %p3238_p3  ;;  %p3089_p12 = scmp.lt.s32.totalorder %s3080_s26, %s3080_s26 }
   0xc   : > { %p2919_p6 = pnand %p2922_p4, %p2918_p5  ;;  %p3090_p13 = por %p3089_p12, %p3088_p11 }
   0xe   : > { %p3071_p7 = pneg %p2919_p6 }
  0x10   : > { %p3083_p9 = pnand %p3081_p8, %p3071_p7 }
  0x12   : > { %p3084_p10 = pneg %p3083_p9 }
  0x14   : > { %p3091_p2 = pnand %p3090_p13, %p3084_p10 }
  0x16   : > { %3094 = shalt.err (!%p3091_p2)
}
  0x17   : > { %s3136_s27 = smov 64   ;;  %s3137_s28 = smov 4  }
  0x18   : > { %s3946_s14 = sld [smem:[#allocation21_spill]] }
  0x1a   : > { %496 = sbr.rel (%p3238_p3) target bundleno = 1686 (0x696), region = 84 }
  0x1e   : > { %2921 = dma.hbm_to_vmem [thread:$0]  (!%p2919_p6), %s3946_s14, 1024, %s451_s24, [#allocation5], %s3136_s27, %s3136_s27, %s3137_s28  }
  0x1f   : > { %3124 = dma.done.wait (%p2922_p4), [#allocation5], 1024  }
  0x20   : > { %3126 = vsyncadd (%p2922_p4), [#allocation5], 4294966272  ;;  %s2368_s0 = sshll.u32 %s3233_s22, 3  ;;  %s2372_s17 = sshll.u32 %s3233_s22, 7 }
  0x21   : > { %p552_p0 = scmp.lt.s32.totalorder %s2368_s0, 15  ;;  %p564_p1 = scmp.lt.s32.totalorder %s2372_s17, 255 }
  0x22   : > { %s3947_s23 = sld [smem:[#allocation20_spill]]  ;;  %p3948_p2 = scmp.ne.s32.totalorder %s3233_s22, 0 }
  0x23   : > { %s3970_s0 = smov (!%p552_p0, %s2368_s0), 15  ;;  %s3972_s17 = smov (!%p564_p1, %s2372_s17), 255 }
  0x24   : > { %s2369_s18 = sshll.u32 %s3970_s0, 2  ;;  %s2373_s28 = sshll.u32 %s3972_s17, 2 }
  0x25   : > { %s3266_s27 = scalar_lea.vmem %s3917_s1, %s2369_s18  ;;  %s3271_s14 = scalar_lea.vmem %s3918_s2, %s2373_s28 }
  0x26   : > { %573 = sbr.rel (%p3948_p2) target bundleno = 45 (0x2d), region = 92 }
  0x28   : > { %s3261_s24 = scalar_lea.vmem %s3947_s23, %s2369_s18 }
  0x2b   : > { %v3138_v0 = vmov 0.0  }
  0x2c   : > { %574 = vst [vmem:[#allocation2] sm:$0xff] %v3138_v0  ;;  %575 = vst [vmem:[#allocation3] sm:$0xff] %v3138_v0 }
  0x2d PF: > { %v3276_v1 = vld [vmem:[%s3271_s14 + $0x78] sm:$0xff]   ;;  %v3291_v5 = vld [vmem:[%s3271_s14 + $0x70] sm:$0xff]   ;;  %v3307_v9 = vld [vmem:[%s3271_s14 + $0x68] sm:$0xff]   ;;  %p2455_p3 = scmp.ne.s32.totalorder %s3233_s22, 1 }
  0x2e   : > { %v3279_v2 = vld [vmem:[%s3271_s14 + $0xf8] sm:$0xff]   ;;  %2502 = vmatprep.subr.bf16.mxu0 %v3276_v1  ;;  %v3295_v6 = vld [vmem:[%s3271_s14 + $0xf0] sm:$0xff]   ;;  %v3311_v10 = vld [vmem:[%s3271_s14 + $0xe8] sm:$0xff]  }
  0x2f   : > { %v3283_v3 = vld [vmem:[%s3271_s14 + $0x38] sm:$0xff]   ;;  %2524 = vmatprep.subr.bf16.mxu1 %v3279_v2  ;;  %v3299_v7 = vld [vmem:[%s3271_s14 + $0x30] sm:$0xff]   ;;  %v3315_v11 = vld [vmem:[%s3271_s14 + $0x28] sm:$0xff]  }
  0x30   : > { %v3287_v4 = vld [vmem:[%s3271_s14 + $0xb8] sm:$0xff]   ;;  %2503 = vmatpush3.bf16.msra.mxu0 %v3283_v3  ;;  %v3303_v8 = vld [vmem:[%s3271_s14 + $0xb0] sm:$0xff]   ;;  %v3319_v12 = vld [vmem:[%s3271_s14 + $0xa8] sm:$0xff]  }
  0x31   : > { %2525 = vmatpush3.bf16.msra.mxu1 %v3287_v4  ;;  %2504 = vmatprep.subr.bf16.mxu0 %v3291_v5  ;;  %v3323_v13 = vld [vmem:[%s3271_s14 + $0x60] sm:$0xff]   ;;  %v3339_v17 = vld [vmem:[%s3271_s14 + $0x58] sm:$0xff]   ;;  %v3355_v21 = vld [vmem:[%s3271_s14 + $0x50] sm:$0xff]  }
  0x32   : > { %2526 = vmatprep.subr.bf16.mxu1 %v3295_v6  ;;  %v3327_v14 = vld [vmem:[%s3271_s14 + $0xe0] sm:$0xff]   ;;  %v3343_v18 = vld [vmem:[%s3271_s14 + $0xd8] sm:$0xff]   ;;  %v3359_v22 = vld [vmem:[%s3271_s14 + $0xd0] sm:$0xff]  }
  0x33   : > { %v3331_v15 = vld [vmem:[%s3271_s14 + $0x20] sm:$0xff]   ;;  %v3347_v19 = vld [vmem:[%s3271_s14 + $0x18] sm:$0xff]   ;;  %v3363_v23 = vld [vmem:[%s3271_s14 + $0x10] sm:$0xff]  }
  0x34   : > { %2505 = vmatpush3.bf16.msra.mxu0 %v3299_v7  ;;  %v3335_v16 = vld [vmem:[%s3271_s14 + $0xa0] sm:$0xff]   ;;  %v3351_v20 = vld [vmem:[%s3271_s14 + $0x98] sm:$0xff]   ;;  %v3367_v24 = vld [vmem:[%s3271_s14 + $0x90] sm:$0xff]  }
  0x35   : > { %2527 = vmatpush3.bf16.msra.mxu1 %v3303_v8  ;;  %2506 = vmatprep.subr.bf16.mxu0 %v3307_v9  ;;  %v3371_v25 = vld [vmem:[%s3271_s14 + $0x48] sm:$0xff]   ;;  %v3387_v29 = vld [vmem:[%s3271_s14 + $0x40] sm:$0xff]   ;;  %v3406_v39 = vld [vmem:[%s3271_s14 + $0x178] sm:$0xff]  }
  0x36   : > { %2528 = vmatprep.subr.bf16.mxu1 %v3311_v10  ;;  %v3375_v26 = vld [vmem:[%s3271_s14 + $0xc8] sm:$0xff]   ;;  %v3391_v30 = vld [vmem:[%s3271_s14 + $0xc0] sm:$0xff]   ;;  %v3409_v40 = vld [vmem:[%s3271_s14 + $0x1f8] sm:$0xff]  }
  0x37   : > { %v3379_v27 = vld [vmem:[%s3271_s14 + $0x8] sm:$0xff]   ;;  %v3395_v31 = vld [vmem:[%s3271_s14] sm:$0xff]   ;;  %v3412_v41 = vld [vmem:[%s3271_s14 + $0x138] sm:$0xff]  }
  0x38   : > { %2507 = vmatpush3.bf16.msra.mxu0 %v3315_v11  ;;  %v3383_v28 = vld [vmem:[%s3271_s14 + $0x88] sm:$0xff]   ;;  %v3399_v32 = vld [vmem:[%s3271_s14 + $0x80] sm:$0xff]   ;;  %v3415_v42 = vld [vmem:[%s3271_s14 + $0x1b8] sm:$0xff]  }
  0x39   : > { %2529 = vmatpush3.bf16.msra.mxu1 %v3319_v12  ;;  %2508 = vmatprep.subr.bf16.mxu0 %v3323_v13  ;;  %v705_v33 = vld [vmem:[%s3261_s24] sm:$0xff]  ;;  %v706_v34 = vld [vmem:[%s3261_s24 + $0x8] sm:$0xff]  ;;  %v3420_v43 = vld [vmem:[%s3271_s14 + $0x170] sm:$0xff]  }
  0x3a   : > { %2530 = vmatprep.subr.bf16.mxu1 %v3327_v14  ;;  %v2375_v35 = vcombine.low %v705_v33, %v705_v33  ;;  %v2376_v36 = vcombine.high %v705_v33, %v705_v33  ;;  %v2377_v37 = vcombine.low %v706_v34, %v706_v34  ;;  %v2378_v38 = vcombine.high %v706_v34, %v706_v34  ;;  %v3425_v44 = vld [vmem:[%s3271_s14 + $0x1f0] sm:$0xff]   ;;  %v3436_v47 = vld [vmem:[%s3271_s14 + $0x168] sm:$0xff]   ;;  %v3452_v51 = vld [vmem:[%s3271_s14 + $0x160] sm:$0xff]  }
  0x3b   : > { %v3429_v45 = vld [vmem:[%s3271_s14 + $0x130] sm:$0xff]   ;;  %v3441_v48 = vld [vmem:[%s3271_s14 + $0x1e8] sm:$0xff]   ;;  %v3457_v52 = vld [vmem:[%s3271_s14 + $0x1e0] sm:$0xff]  }
  0x3c   : > { %2509 = vmatpush3.bf16.msra.mxu0 %v3331_v15  ;;  %1153 = vmatprep.mubr.bf16.mxu0 %v2376_v36  ;;  %v3433_v46 = vld [vmem:[%s3271_s14 + $0x1b0] sm:$0xff]   ;;  %v3445_v49 = vld [vmem:[%s3271_s14 + $0x128] sm:$0xff]   ;;  %v3461_v53 = vld [vmem:[%s3271_s14 + $0x120] sm:$0xff]  }
  0x3d   : > { %2531 = vmatpush3.bf16.msra.mxu1 %v3335_v16  ;;  %2510 = vmatprep.subr.bf16.mxu0 %v3339_v17  ;;  %v3449_v50 = vld [vmem:[%s3271_s14 + $0x1a8] sm:$0xff]   ;;  %v3465_v54 = vld [vmem:[%s3271_s14 + $0x1a0] sm:$0xff]   ;;  %v3468_v55 = vld [vmem:[%s3271_s14 + $0x158] sm:$0xff]  }
  0x3e   : > { %2532 = vmatprep.subr.bf16.mxu1 %v3343_v18  ;;  %1193 = vmatprep.mubr.bf16.mxu1 %v2378_v38  ;;  %v3473_v56 = vld [vmem:[%s3271_s14 + $0x1d8] sm:$0xff]   ;;  %v3484_v59 = vld [vmem:[%s3271_s14 + $0x150] sm:$0xff]   ;;  %v3500_v63 = vld [vmem:[%s3271_s14 + $0x148] sm:$0xff]  }
  0x3f   : > { %v3477_v57 = vld [vmem:[%s3271_s14 + $0x118] sm:$0xff]   ;;  %3949 = vst [vmem:[#allocation10_spill] sm:$0xff] %v3484_v59  ;;  %v3489_v60 = vld [vmem:[%s3271_s14 + $0x1d0] sm:$0xff]   ;;  %3953 = vst [vmem:[#allocation14_spill] sm:$0xff] %v3500_v63 }
  0x40   : > { %2511 = vmatpush3.bf16.msra.mxu0 %v3347_v19  ;;  %v3481_v58 = vld [vmem:[%s3271_s14 + $0x198] sm:$0xff]   ;;  %3950 = vst [vmem:[#allocation11_spill] sm:$0xff] %v3489_v60  ;;  %v3493_v61 = vld [vmem:[%s3271_s14 + $0x110] sm:$0xff]   ;;  %v3505_v0 = vld [vmem:[%s3271_s14 + $0x1c8] sm:$0xff]  }
  0x41   : > { %2533 = vmatpush3.bf16.msra.mxu1 %v3351_v20  ;;  %2512 = vmatprep.subr.bf16.mxu0 %v3355_v21  ;;  %3951 = vst [vmem:[#allocation12_spill] sm:$0xff] %v3493_v61  ;;  %v3497_v62 = vld [vmem:[%s3271_s14 + $0x190] sm:$0xff]   ;;  %3954 = vst [vmem:[#allocation15_spill] sm:$0xff] %v3505_v0  ;;  %v3509_v33 = vld [vmem:[%s3271_s14 + $0x108] sm:$0xff]  }
  0x42   : > { %2534 = vmatprep.subr.bf16.mxu1 %v3359_v22  ;;  %3952 = vst [vmem:[#allocation13_spill] sm:$0xff] %v3497_v62  ;;  %3955 = vst [vmem:[#allocation16_spill] sm:$0xff] %v3509_v33  ;;  %v3513_v34 = vld [vmem:[%s3271_s14 + $0x188] sm:$0xff]   ;;  %v3521_v36 = vld [vmem:[%s3271_s14 + $0x1c0] sm:$0xff]  }
  0x43   : > { %3956 = vst [vmem:[#allocation17_spill] sm:$0xff] %v3513_v34  ;;  %3958 = vst [vmem:[#allocation19_spill] sm:$0xff] %v3521_v36  ;;  %v3529_v38 = vld [vmem:[%s3271_s14 + $0x180] sm:$0xff]  }
  0x44   : > { %2513 = vmatpush3.bf16.msra.mxu0 %v3363_v23 }
  0x45   : > { %2535 = vmatpush3.bf16.msra.mxu1 %v3367_v24  ;;  %2514 = vmatprep.subr.bf16.mxu0 %v3371_v25 }
  0x46   : > { %2536 = vmatprep.subr.bf16.mxu1 %v3375_v26 }
  0x48   : > { %2515 = vmatpush3.bf16.msra.mxu0 %v3379_v27 }
  0x49   : > { %2537 = vmatpush3.bf16.msra.mxu1 %v3383_v28  ;;  %2516 = vmatprep.subr.bf16.mxu0 %v3387_v29 }
  0x4a   : > { %2538 = vmatprep.subr.bf16.mxu1 %v3391_v30 }
  0x4c   : > { %2517 = vmatpush3.bf16.msra.mxu0 %v3395_v31 }
  0x4d   : > { %2539 = vmatpush3.bf16.msra.mxu1 %v3399_v32  ;;  %2546 = vmatprep.subr.bf16.mxu0 %v3406_v39 }
  0x4e   : > { %2568 = vmatprep.subr.bf16.mxu1 %v3409_v40 }
  0x4f   : > { %1154 = vmatmul.mubr.bf16.vlgmr.msra.gmra.mxu0 %v2375_v35  ;;  %v3516_v35 = vld [vmem:[%s3271_s14 + $0x140] sm:$0xff]  }
  0x50   : > { %1194 = vmatmul.mubr.bf16.vlgmr.msra.gmra.mxu1 %v2377_v37  ;;  %2547 = vmatpush3.bf16.msra.mxu0 %v3412_v41  ;;  %3957 = vst [vmem:[#allocation18_spill] sm:$0xff] %v3516_v35  ;;  %v3525_v37 = vld [vmem:[%s3271_s14 + $0x100] sm:$0xff]  }
  0x51   : > { %2569 = vmatpush3.bf16.msra.mxu1 %v3415_v42  ;;  %2548 = vmatprep.subr.bf16.mxu0 %v3420_v43 }
  0x52   : > { %2570 = vmatprep.subr.bf16.mxu1 %v3425_v44 }
  0x54   : > { %2549 = vmatpush3.bf16.msra.mxu0 %v3429_v45 }
  0x55   : > { %2571 = vmatpush3.bf16.msra.mxu1 %v3433_v46  ;;  %2550 = vmatprep.subr.bf16.mxu0 %v3436_v47 }
  0x56   : > { %2572 = vmatprep.subr.bf16.mxu1 %v3441_v48 }
  0x58   : > { %2551 = vmatpush3.bf16.msra.mxu0 %v3445_v49 }
  0x59   : > { %2573 = vmatpush3.bf16.msra.mxu1 %v3449_v50  ;;  %2552 = vmatprep.subr.bf16.mxu0 %v3452_v51 }
  0x5a   : > { %2574 = vmatprep.subr.bf16.mxu1 %v3457_v52 }
  0x5c   : > { %2553 = vmatpush3.bf16.msra.mxu0 %v3461_v53 }
  0x5d   : > { %2575 = vmatpush3.bf16.msra.mxu1 %v3465_v54  ;;  %2554 = vmatprep.subr.bf16.mxu0 %v3468_v55 }
  0x5e   : > { %2576 = vmatprep.subr.bf16.mxu1 %v3473_v56 }
  0x60   : > { %2555 = vmatpush3.bf16.msra.mxu0 %v3477_v57 }
  0x61   : > { %2577 = vmatpush3.bf16.msra.mxu1 %v3481_v58  ;;  %2556 = vmatprep.subr.bf16.mxu0 %v3484_v59  ;;  %v1285_v59 = vld [vmem:[%s3266_s27 + $0x8] sm:$0xff] }
  0x62   : > { %2578 = vmatprep.subr.bf16.mxu1 %v3489_v60  ;;  %v1284_v60 = vld [vmem:[%s3266_s27] sm:$0xff] }
  0x64   : > { %2557 = vmatpush3.bf16.msra.mxu0 %v3493_v61  ;;  %v708_v61 = vld [vmem:[%s3261_s24 + $0x18] sm:$0xff] }
  0x65   : > { %2579 = vmatpush3.bf16.msra.mxu1 %v3497_v62  ;;  %2558 = vmatprep.subr.bf16.mxu0 %v3500_v63  ;;  %v707_v63 = vld [vmem:[%s3261_s24 + $0x10] sm:$0xff] }
  0x66   : > { %2580 = vmatprep.subr.bf16.mxu1 %v3505_v0  ;;  %v2379_v0 = vcombine.low %v707_v63, %v707_v63  ;;  %v2380_v62 = vcombine.high %v707_v63, %v707_v63 }
  0x68   : > { %2559 = vmatpush3.bf16.msra.mxu0 %v3509_v33  ;;  %v2382_v33 = vcombine.high %v708_v61, %v708_v61  ;;  %1233 = vmatprep.mubr.bf16.mxu0 %v2380_v62 }
  0x69   : > { %2581 = vmatpush3.bf16.msra.mxu1 %v3513_v34  ;;  %2560 = vmatprep.subr.bf16.mxu0 %v3516_v35  ;;  %v2381_v34 = vcombine.low %v708_v61, %v708_v61  ;;  %v2450_v35 = vcombine.high %v1285_v59, %v1285_v59 }
  0x6a   : > { %2582 = vmatprep.subr.bf16.mxu1 %v3521_v36  ;;  %1273 = vmatprep.mubr.bf16.mxu1 %v2382_v33  ;;  %v2448_v36 = vcombine.high %v1284_v60, %v1284_v60 }
  0x6c   : > { %2561 = vmatpush3.bf16.msra.mxu0 %v3525_v37 }
  0x6d   : > { %2583 = vmatpush3.bf16.msra.mxu1 %v3529_v38  ;;  %2590 = vmatprep.subr.bf16.mxu0 %v3276_v1  ;;  %v2447_v1 = vcombine.low %v1284_v60, %v1284_v60 }
  0x6e   : > { %2612 = vmatprep.subr.bf16.mxu1 %v3279_v2  ;;  %v2449_v2 = vcombine.low %v1285_v59, %v1285_v59 }
  0x6f   : > { %1234 = vmatmul.mubr.bf16.vlgmr.msra.gmra.mxu0 %v2379_v0 }
  0x70   : > { %1274 = vmatmul.mubr.bf16.vlgmr.msra.gmra.mxu1 %v2381_v34  ;;  %2591 = vmatpush3.bf16.msra.mxu0 %v3283_v3  ;;  %v1286_v3 = vld [vmem:[%s3266_s27 + $0x10] sm:$0xff] }
  0x71   : > { %2613 = vmatpush3.bf16.msra.mxu1 %v3287_v4  ;;  %2592 = vmatprep.subr.bf16.mxu0 %v3291_v5  ;;  %v1287_v4 = vld [vmem:[%s3266_s27 + $0x18] sm:$0xff]  ;;  %v2452_v5 = vcombine.high %v1286_v3, %v1286_v3 }
  0x72   : > { %2614 = vmatprep.subr.bf16.mxu1 %v3295_v6  ;;  %1348 = vmatprep.mubr.bf16.mxu0 %v2448_v36  ;;  %v2454_v6 = vcombine.high %v1287_v4, %v1287_v4 }
  0x73   : > { %1388 = vmatprep.mubr.bf16.mxu1 %v2450_v35 }
  0x74   : > { %2593 = vmatpush3.bf16.msra.mxu0 %v3299_v7  ;;  %v3959_v7 = vld [vmem:[#allocation10_spill] sm:$0xff] }
  0x75   : > { %2615 = vmatpush3.bf16.msra.mxu1 %v3303_v8  ;;  %2594 = vmatprep.subr.bf16.mxu0 %v3307_v9  ;;  %v3960_v8 = vld [vmem:[#allocation11_spill] sm:$0xff]  ;;  %v3961_v9 = vld [vmem:[#allocation12_spill] sm:$0xff] }
  0x76   : > { %2616 = vmatprep.subr.bf16.mxu1 %v3311_v10  ;;  %v3962_v10 = vld [vmem:[#allocation13_spill] sm:$0xff] }
  0x78   : > { %2595 = vmatpush3.bf16.msra.mxu0 %v3315_v11  ;;  %v3963_v11 = vld [vmem:[#allocation14_spill] sm:$0xff] }
  0x79   : > { %2617 = vmatpush3.bf16.msra.mxu1 %v3319_v12  ;;  %2596 = vmatprep.subr.bf16.mxu0 %v3323_v13  ;;  %v3964_v12 = vld [vmem:[#allocation15_spill] sm:$0xff]  ;;  %v3965_v13 = vld [vmem:[#allocation16_spill] sm:$0xff] }
  0x7a   : > { %2618 = vmatprep.subr.bf16.mxu1 %v3327_v14  ;;  %v3966_v14 = vld [vmem:[#allocation17_spill] sm:$0xff] }
  0x7c   : > { %2597 = vmatpush3.bf16.msra.mxu0 %v3331_v15  ;;  %v3967_v15 = vld [vmem:[#allocation18_spill] sm:$0xff] }
  0x7d   : > { %2619 = vmatpush3.bf16.msra.mxu1 %v3335_v16  ;;  %2598 = vmatprep.subr.bf16.mxu0 %v3339_v17  ;;  %v3968_v16 = vld [vmem:[#allocation19_spill] sm:$0xff]  ;;  %v2451_v17 = vcombine.low %v1286_v3, %v1286_v3 }
  0x7e   : > { %2620 = vmatprep.subr.bf16.mxu1 %v3343_v18  ;;  %v2453_v18 = vcombine.low %v1287_v4, %v1287_v4 }
  0x80   : > { %2599 = vmatpush3.bf16.msra.mxu0 %v3347_v19 }
  0x81   : > { %2621 = vmatpush3.bf16.msra.mxu1 %v3351_v20  ;;  %2600 = vmatprep.subr.bf16.mxu0 %v3355_v21 }
  0x82   : > { %2622 = vmatprep.subr.bf16.mxu1 %v3359_v22 }
  0x84   : > { %2601 = vmatpush3.bf16.msra.mxu0 %v3363_v23 }
  0x85   : > { %2623 = vmatpush3.bf16.msra.mxu1 %v3367_v24  ;;  %2602 = vmatprep.subr.bf16.mxu0 %v3371_v25 }
  0x86   : > { %2624 = vmatprep.subr.bf16.mxu1 %v3375_v26 }
  0x88   : > { %2603 = vmatpush3.bf16.msra.mxu0 %v3379_v27 }
  0x89   : > { %2625 = vmatpush3.bf16.msra.mxu1 %v3383_v28  ;;  %2604 = vmatprep.subr.bf16.mxu0 %v3387_v29 }
  0x8a   : > { %2626 = vmatprep.subr.bf16.mxu1 %v3391_v30 }
  0x8c   : > { %2605 = vmatpush3.bf16.msra.mxu0 %v3395_v31 }
  0x8d   : > { %2627 = vmatpush3.bf16.msra.mxu1 %v3399_v32  ;;  %2634 = vmatprep.subr.bf16.mxu0 %v3406_v39 }
  0x8e   : > { %2656 = vmatprep.subr.bf16.mxu1 %v3409_v40 }
  0x8f   : > { %1349 = vmatmul.mubr.bf16.vlgmr.msra.gmra.mxu0 %v2447_v1 }
  0x90   : > { %1389 = vmatmul.mubr.bf16.vlgmr.msra.gmra.mxu1 %v2449_v2  ;;  %2635 = vmatpush3.bf16.msra.mxu0 %v3412_v41 }
  0x91   : > { %2657 = vmatpush3.bf16.msra.mxu1 %v3415_v42  ;;  %2636 = vmatprep.subr.bf16.mxu0 %v3420_v43 }
  0x92   : > { %2658 = vmatprep.subr.bf16.mxu1 %v3425_v44  ;;  %1428 = vmatprep.mubr.bf16.mxu0 %v2452_v5 }
  0x93   : > { %1468 = vmatprep.mubr.bf16.mxu1 %v2454_v6 }
  0x94   : > { %2637 = vmatpush3.bf16.msra.mxu0 %v3429_v45  ;;  %v704_v45 = vld [vmem:[#allocation2] sm:$0xff] }
  0x95   : > { %2659 = vmatpush3.bf16.msra.mxu1 %v3433_v46  ;;  %2638 = vmatprep.subr.bf16.mxu0 %v3436_v47 }
  0x96   : > { %2660 = vmatprep.subr.bf16.mxu1 %v3441_v48 }
  0x98   : > { %2639 = vmatpush3.bf16.msra.mxu0 %v3445_v49 }
  0x99   : > { %2661 = vmatpush3.bf16.msra.mxu1 %v3449_v50  ;;  %2640 = vmatprep.subr.bf16.mxu0 %v3452_v51 }
  0x9a   : > { %2662 = vmatprep.subr.bf16.mxu1 %v3457_v52 }
  0x9c   : > { %2641 = vmatpush3.bf16.msra.mxu0 %v3461_v53 }
  0x9d   : > { %2663 = vmatpush3.bf16.msra.mxu1 %v3465_v54  ;;  %2642 = vmatprep.subr.bf16.mxu0 %v3468_v55 }
  0x9e   : > { %2664 = vmatprep.subr.bf16.mxu1 %v3473_v56 }
  0xa0   : > { %2643 = vmatpush3.bf16.msra.mxu0 %v3477_v57 }
  0xa1   : > { %2665 = vmatpush3.bf16.msra.mxu1 %v3481_v58  ;;  %2644 = vmatprep.subr.bf16.mxu0 %v3959_v7 }
  0xa2   : > { %2666 = vmatprep.subr.bf16.mxu1 %v3960_v8 }
  0xa4   : > { %2645 = vmatpush3.bf16.msra.mxu0 %v3961_v9 }
  0xa5   : > { %2667 = vmatpush3.bf16.msra.mxu1 %v3962_v10  ;;  %2646 = vmatprep.subr.bf16.mxu0 %v3963_v11 }
  0xa6   : > { %2668 = vmatprep.subr.bf16.mxu1 %v3964_v12 }
  0xa8   : > { %2647 = vmatpush3.bf16.msra.mxu0 %v3965_v13 }
  0xa9   : > { %2669 = vmatpush3.bf16.msra.mxu1 %v3966_v14  ;;  %2648 = vmatprep.subr.bf16.mxu0 %v3967_v15 }
  0xaa   : > { %2670 = vmatprep.subr.bf16.mxu1 %v3968_v16 }
  0xac   : > { %2649 = vmatpush3.bf16.msra.mxu0 %v3525_v37 }
  0xad   : > { %2671 = vmatpush3.bf16.msra.mxu1 %v3529_v38  ;;  %v1283_v38 = vld [vmem:[#allocation3] sm:$0xff] }
  0xaf   : > { %1429 = vmatmul.mubr.bf16.vlgmr.msra.gmra.mxu0 %v2451_v17 }
  0xb0   : > { %1469 = vmatmul.mubr.bf16.vlgmr.msra.gmra.mxu1 %v2453_v18 }
 0x10f   : > { %v2518_v19 = vpop.f32.mrf.mxu0 }
 0x110   : > { %v2540_v20 = vpop.f32.mrf.mxu1 }
 0x111   : > { %v2519_v21 = vpop.f32.mrf.mxu0 }
 0x112   : > { %v2541_v22 = vpop.f32.mrf.mxu1  ;;  %v2520_v27 = vadd.f32 %v2519_v21, %v2518_v19 }
 0x113   : > { %v2521_v23 = vpop.f32.mrf.mxu0  ;;  %v2542_v28 = vadd.f32 %v2541_v22, %v2540_v20 }
 0x114   : > { %v2543_v24 = vpop.f32.mrf.mxu1 }
 0x115   : > { %v2522_v25 = vpop.f32.mrf.mxu0  ;;  %v1196_v39 = vadd.f32 %v2542_v28, %v2520_v27 }
 0x116   : > { %v2544_v26 = vpop.f32.mrf.mxu1 }
 0x12f   : > { %v2562_v29 = vpop.f32.mrf.mxu0 }
 0x130   : > { %v2584_v30 = vpop.f32.mrf.mxu1 }
 0x131   : > { %v2563_v31 = vpop.f32.mrf.mxu0 }
 0x132   : > { %v2585_v32 = vpop.f32.mrf.mxu1  ;;  %v2564_v40 = vadd.f32 %v2563_v31, %v2562_v29 }
 0x133   : > { %v2586_v41 = vadd.f32 %v2585_v32, %v2584_v30  ;;  %v2565_v42 = vpop.f32.mrf.mxu0 }
 0x134   : > { %v2587_v43 = vpop.f32.mrf.mxu1  ;;  %v1236_v44 = vadd.f32 %v2564_v40, %v1196_v39 }
 0x135   : > { %v2566_v46 = vpop.f32.mrf.mxu0 }
 0x136   : > { %v2588_v47 = vpop.f32.mrf.mxu1  ;;  %v1276_v48 = vadd.f32 %v2586_v41, %v1236_v44 }
 0x138   : > { %v1281_v49 = vadd.f32 %v1276_v48, %v704_v45 }
 0x13a   : > { %1282 = vst [vmem:[#allocation2] sm:$0xff] %v1281_v49 }
 0x14f   : > { %v2606_v50 = vpop.f32.mrf.mxu0 }
 0x150   : > { %v2628_v51 = vpop.f32.mrf.mxu1 }
 0x151   : > { %v2607_v52 = vpop.f32.mrf.mxu0 }
 0x152   : > { %v2629_v53 = vpop.f32.mrf.mxu1  ;;  %v2608_v58 = vadd.f32 %v2607_v52, %v2606_v50 }
 0x153   : > { %v2609_v54 = vpop.f32.mrf.mxu0  ;;  %v2630_v59 = vadd.f32 %v2629_v53, %v2628_v51 }
 0x154   : > { %v2631_v55 = vpop.f32.mrf.mxu1 }
 0x155   : > { %v2610_v56 = vpop.f32.mrf.mxu0  ;;  %v1391_v0 = vadd.f32 %v2630_v59, %v2608_v58 }
 0x156   : > { %v2632_v57 = vpop.f32.mrf.mxu1 }
 0x16f   : > { %v2650_v60 = vpop.f32.mrf.mxu0 }
 0x170   : > { %v2672_v61 = vpop.f32.mrf.mxu1 }
 0x171   : > { %v2651_v62 = vpop.f32.mrf.mxu0 }
 0x172   : > { %v2673_v63 = vpop.f32.mrf.mxu1  ;;  %v2652_v33 = vadd.f32 %v2651_v62, %v2650_v60 }
 0x173   : > { %v2653_v34 = vpop.f32.mrf.mxu0  ;;  %v2674_v37 = vadd.f32 %v2673_v63, %v2672_v61 }
 0x174   : > { %v2675_v35 = vpop.f32.mrf.mxu1  ;;  %v1431_v36 = vadd.f32 %v2652_v33, %v1391_v0 }
 0x175   : > { %v2654_v1 = vpop.f32.mrf.mxu0 }
 0x176   : > { %v2676_v2 = vpop.f32.mrf.mxu1  ;;  %v1471_v3 = vadd.f32 %v2674_v37, %v1431_v36  ;;  %1481 = sbr.rel (%p2455_p3) target bundleno = 1671 (0x687), region = 96 }
 0x178   : > { %v1476_v4 = vadd.f32 %v1471_v3, %v1283_v38 }
 0x17a   : > { %1477 = vst [vmem:[#allocation3] sm:$0xff] %v1476_v4 }
 0x17b   : > { %v3021_v5 = vld [vmem:[%s3920_s4 + $0x38] sm:$0xff]   ;;  %v3139_v6 = vmov 0.0   ;;  %v3022_v7 = vld [vmem:[%s3920_s4 + $0x30] sm:$0xff]   ;;  %vm3140_vm0 = vmmov 0   ;;  %v3023_v8 = vld [vmem:[%s3920_s4 + $0x28] sm:$0xff]   ;;  %v1482_v43 = vlaneseq }
 0x17c   : > { %2750 = vmatprep.subr.bf16.mxu0 %v3139_v6  ;;  %2770 = vmatprep.subr.bf16.mxu1 %v3139_v6  ;;  %v2457_v9 = vld [vmem:[%s3919_s3] ss:$0 sm:$0xff]  ;;  %v3025_v14 = vld [vmem:[%s3920_s4 + $0x18] sm:$0xff]   ;;  %v3026_v15 = vld [vmem:[%s3920_s4 + $0x10] sm:$0xff]  }
 0x17d   : > { %2751 = vmatpush3.bf16.msra.mxu0 %v3021_v5  ;;  %2766 = vmatprep.mubr.msk.bf16.mxu0 %vm3140_vm0, %v3139_v6  ;;  %v1488_v10 = vld [vmem:[#allocation2] sm:$0xff]  ;;  %v3027_v16 = vld [vmem:[%s3920_s4 + $0x8] sm:$0xff]   ;;  %v3660_v23 = vld [vmem:[%s3924_s8 + $0x38] sm:$0xff]   ;;  %v1483_v45 = vshrl.u32 %v1482_v43, 7 }
 0x17e   : > { %2752 = vmatprep.subr.bf16.mxu0 %v3139_v6  ;;  %2786 = vmatprep.mubr.msk.bf16.mxu1 %vm3140_vm0, %v3139_v6  ;;  %v3024_v11 = vld [vmem:[%s3920_s4 + $0x20] sm:$0xff]   ;;  %v1495_v12 = vadd.f32 %v2457_v9, %v1488_v10  ;;  %v3667_v24 = vld [vmem:[%s3924_s8 + $0x30] sm:$0xff]   ;;  %v3674_v25 = vld [vmem:[%s3924_s8 + $0x28] sm:$0xff]  }
 0x17f   : > { %v3028_v17 = vld [vmem:[%s3920_s4] sm:$0xff]   ;;  %2771 = vmatpush3.bf16.msra.mxu1 %v3660_v23  ;;  %v3688_v27 = vld [vmem:[%s3924_s8 + $0x18] sm:$0xff]   ;;  %v3695_v28 = vld [vmem:[%s3924_s8 + $0x10] sm:$0xff]   ;;  %vm1484_vm1 = vcmp.lt.s32.totalorder %v1483_v45, 2 }
 0x180   : > { %v1496_v13 = vmax.f32 %v1495_v12, 0.0  ;;  %2772 = vmatprep.subr.bf16.mxu1 %v3139_v6  ;;  %v3681_v26 = vld [vmem:[%s3924_s8 + $0x20] sm:$0xff]   ;;  %v3702_v29 = vld [vmem:[%s3924_s8 + $0x8] sm:$0xff]   ;;  %v3716_v31 = vld [vmem:[%s3926_s10 + $0x38] sm:$0xff]   ;;  %v3766_v47 = vsel %vm1484_vm1, 1.0, %v3139_v6 }
 0x181   : > { %2753 = vmatpush3.bf16.msra.mxu0 %v3022_v7  ;;  %v1497_v19 = vld [vmem:[#allocation3] sm:$0xff]  ;;  %v3709_v30 = vld [vmem:[%s3924_s8] sm:$0xff]   ;;  %v3722_v32 = vld [vmem:[%s3926_s10 + $0x30] sm:$0xff]  }
 0x182   : > { %2754 = vmatprep.subr.bf16.mxu0 %v3139_v6  ;;  %v1536_v18 = vpack.c.bf16 %v1496_v13, %v1496_v13  ;;  %v1498_v20 = vadd.f32 %v2457_v9, %v1497_v19  ;;  %v3729_v39 = vld [vmem:[%s3926_s10 + $0x28] sm:$0xff]   ;;  %v3736_v40 = vld [vmem:[%s3926_s10 + $0x20] sm:$0xff]   ;;  %v3743_v41 = vld [vmem:[%s3926_s10 + $0x18] sm:$0xff]  }
 0x183   : > { %2773 = vmatpush3.bf16.msra.mxu1 %v3667_v24  ;;  %v3750_v42 = vld [vmem:[%s3926_s10 + $0x10] sm:$0xff]   ;;  %v3757_v44 = vld [vmem:[%s3926_s10 + $0x8] sm:$0xff]   ;;  %v2458_v46 = vld [vmem:[%s3921_s5] ss:$0 sm:$0xff] }
 0x184   : > { %v1499_v21 = vmax.f32 %v1498_v20, 0.0  ;;  %2774 = vmatprep.subr.bf16.mxu1 %v3139_v6  ;;  %v2467_v19 = vld [vmem:[%s3922_s6] ss:$0 sm:$0xff] }
 0x185   : > { %2755 = vmatpush3.bf16.msra.mxu0 %v3023_v8 }
 0x186   : > { %2756 = vmatprep.subr.bf16.mxu0 %v3139_v6  ;;  %v1762_v22 = vpack.c.bf16 %v1499_v21, %v1499_v21 }
 0x187   : > { %2775 = vmatpush3.bf16.msra.mxu1 %v3674_v25 }
 0x188   : > { %2776 = vmatprep.subr.bf16.mxu1 %v3139_v6 }
 0x189   : > { %2757 = vmatpush3.bf16.msra.mxu0 %v3024_v11 }
 0x18a   : > { %2758 = vmatprep.subr.bf16.mxu0 %v3139_v6 }
 0x18b   : > { %2777 = vmatpush3.bf16.msra.mxu1 %v3681_v26 }
 0x18c   : > { %2778 = vmatprep.subr.bf16.mxu1 %v3139_v6 }
 0x18d   : > { %2759 = vmatpush3.bf16.msra.mxu0 %v3025_v14 }
 0x18e   : > { %2760 = vmatprep.subr.bf16.mxu0 %v3139_v6 }
 0x18f   : > { %2779 = vmatpush3.bf16.msra.mxu1 %v3688_v27 }
 0x190   : > { %2780 = vmatprep.subr.bf16.mxu1 %v3139_v6 }
 0x191   : > { %2761 = vmatpush3.bf16.msra.mxu0 %v3026_v15 }
 0x192   : > { %2762 = vmatprep.subr.bf16.mxu0 %v3139_v6 }
 0x193   : > { %2781 = vmatpush3.bf16.msra.mxu1 %v3695_v28 }
 0x194   : > { %2782 = vmatprep.subr.bf16.mxu1 %v3139_v6 }
 0x195   : > { %2763 = vmatpush3.bf16.msra.mxu0 %v3027_v16 }
 0x196   : > { %2764 = vmatprep.subr.bf16.mxu0 %v3139_v6 }
 0x197   : > { %2783 = vmatpush3.bf16.msra.mxu1 %v3702_v29 }
 0x198   : > { %2784 = vmatprep.subr.bf16.mxu1 %v3139_v6 }
 0x199   : > { %2765 = vmatpush3.bf16.msra.mxu0 %v3028_v17 }
 0x19a   : > { %2790 = vmatprep.subr.bf16.mxu0 %v3139_v6 }
 0x19b   : > { %2785 = vmatpush3.bf16.msra.mxu1 %v3709_v30 }
 0x19c   : > { %2767 = vmatmul.mubr.bf16.vlgmr.msra.gmra.mxu0 %v1536_v18  ;;  %2810 = vmatprep.subr.bf16.mxu1 %v3139_v6 }
 0x19d   : > { %2791 = vmatpush3.bf16.msra.mxu0 %v3021_v5  ;;  %2806 = vmatprep.mubr.msk.bf16.mxu0 %vm3140_vm0, %v3139_v6 }
 0x19e   : > { %2792 = vmatprep.subr.bf16.mxu0 %v3139_v6 }
 0x1a1   : > { %2793 = vmatpush3.bf16.msra.mxu0 %v3022_v7 }
 0x1a2   : > { %2794 = vmatprep.subr.bf16.mxu0 %v3139_v6 }
 0x1a5   : > { %2795 = vmatpush3.bf16.msra.mxu0 %v3023_v8 }
 0x1a6   : > { %2796 = vmatprep.subr.bf16.mxu0 %v3139_v6 }
 0x1a9   : > { %2797 = vmatpush3.bf16.msra.mxu0 %v3024_v11 }
 0x1aa   : > { %2798 = vmatprep.subr.bf16.mxu0 %v3139_v6 }
 0x1ad   : > { %2799 = vmatpush3.bf16.msra.mxu0 %v3025_v14 }
 0x1ae   : > { %2800 = vmatprep.subr.bf16.mxu0 %v3139_v6 }
 0x1b1   : > { %2801 = vmatpush3.bf16.msra.mxu0 %v3026_v15 }
 0x1b2   : > { %2802 = vmatprep.subr.bf16.mxu0 %v3139_v6 }
 0x1b5   : > { %2803 = vmatpush3.bf16.msra.mxu0 %v3027_v16 }
 0x1b6   : > { %2804 = vmatprep.subr.bf16.mxu0 %v3139_v6 }
 0x1b9   : > { %2805 = vmatpush3.bf16.msra.mxu0 %v3028_v17 }
 0x1ba   : > { %2830 = vmatprep.subr.bf16.mxu0 %v3139_v6 }
 0x1bc   : > { %2807 = vmatmul.mubr.bf16.vlgmr.msra.gmra.mxu0 %v1762_v22  ;;  %v2468_v22 = vld [vmem:[%s3923_s7] ss:$0 sm:$0xff] }
 0x1bd   : > { %2846 = vmatprep.mubr.msk.bf16.mxu0 %vm3140_vm0, %v3139_v6  ;;  %2831 = vmatpush3.bf16.msra.mxu0 %v3716_v31 }
 0x1be   : > { %2832 = vmatprep.subr.bf16.mxu0 %v3139_v6 }
 0x1c1   : > { %2833 = vmatpush3.bf16.msra.mxu0 %v3722_v32 }
 0x1c2   : > { %2834 = vmatprep.subr.bf16.mxu0 %v3139_v6 }
 0x1c5   : > { %2835 = vmatpush3.bf16.msra.mxu0 %v3729_v39 }
 0x1c6   : > { %2836 = vmatprep.subr.bf16.mxu0 %v3139_v6 }
 0x1c9   : > { %2837 = vmatpush3.bf16.msra.mxu0 %v3736_v40 }
 0x1ca   : > { %2838 = vmatprep.subr.bf16.mxu0 %v3139_v6 }
 0x1cd   : > { %2839 = vmatpush3.bf16.msra.mxu0 %v3743_v41 }
 0x1ce   : > { %2840 = vmatprep.subr.bf16.mxu0 %v3139_v6 }
 0x1d1   : > { %2841 = vmatpush3.bf16.msra.mxu0 %v3750_v42 }
 0x1d2   : > { %2842 = vmatprep.subr.bf16.mxu0 %v3139_v6 }
 0x1d5   : > { %2843 = vmatpush3.bf16.msra.mxu0 %v3757_v44 }
 0x1d6   : > { %2844 = vmatprep.subr.bf16.mxu0 %v3139_v6 }
 0x25c   : > { %v1625_v48 = vpop.f32.mrf.mxu0 }
 0x25d   : > { %v1626_v49 = vadd.f32 %v2458_v46, %v1625_v48 }
 0x25e   : > { %v2768_v50 = vpop.f32.mrf.mxu0 }
 0x25f   : > { %v1631_v51 = vmul.f32 %v3766_v47, %v1626_v49 }
 0x260   : > { %v1628_v52 = vpop.f32.mrf.mxu0 }
 0x261   : > { %v1632_v53 = vrot.slane %v1631_v51, 4 }
 0x262   : > { %v2769_v54 = vpop.f32.mrf.mxu0 }
 0x263   : > { %v1633_v55 = vadd.f32 %v1632_v53, %v1631_v51 }
 0x265   : > { %v1634_v56 = vrot.slane %v1633_v55, 2 }
 0x267   : > { %v1635_v57 = vadd.f32 %v1634_v56, %v1633_v55 }
 0x269   : > { %v1636_v58 = vrot.slane %v1635_v57, 1 }
 0x26b   : > { %v1637_v59 = vadd.f32 %v1636_v58, %v1635_v57 }
 0x26d   : > { %v1638_v60 = vmul.f32 0.5, %v1637_v59 }
 0x26f   : > { %v1639_v61 = vsub.f32 %v1626_v49, %v1638_v60 }
 0x271   : > { %v1640_v62 = vmul.f32 %v1639_v61, %v1639_v61 }
 0x273   : > { %v1641_v63 = vmul.f32 %v3766_v47, %v1640_v62 }
 0x275   : > { %v1642_v0 = vrot.slane %v1641_v63, 4 }
 0x277   : > { %v1643_v33 = vadd.f32 %v1642_v0, %v1641_v63 }
 0x279   : > { %v1644_v34 = vrot.slane %v1643_v33, 2 }
 0x27b   : > { %v1645_v35 = vadd.f32 %v1644_v34, %v1643_v33  ;;  %v3833_v33 = vld [vmem:[#allocation4 + $0x38] sm:$0xff]   ;;  %v3841_v34 = vld [vmem:[#allocation4 + $0x28] sm:$0xff]  }
 0x27c   : > { %v1797_v36 = vpop.f32.mrf.mxu0 }
 0x27d   : > { %v1646_v37 = vrot.slane %v1645_v35, 1  ;;  %v1798_v38 = vadd.f32 %v2458_v46, %v1797_v36  ;;  %v3849_v36 = vld [vmem:[#allocation4 + $0x18] sm:$0xff]  }
 0x27e   : > { %v2808_v1 = vpop.f32.mrf.mxu0 }
 0x27f   : > { %v1647_v2 = vadd.f32 %v1646_v37, %v1645_v35  ;;  %v1803_v3 = vmul.f32 %v3766_v47, %v1798_v38  ;;  %v3845_v35 = vld [vmem:[#allocation4 + $0x20] sm:$0xff]   ;;  %v3853_v37 = vld [vmem:[#allocation4 + $0x10] sm:$0xff]  }
 0x280   : > { %v1800_v4 = vpop.f32.mrf.mxu0  ;;  %v3861_v1 = vld [vmem:[#allocation4] sm:$0xff]  }
 0x281   : > { %v1648_v5 = vmul.f32 0.5, %v1647_v2  ;;  %v1804_v7 = vrot.slane %v1803_v3, 4  ;;  %v2478_v2 = vld [vmem:[%s3927_s11] ss:$0 sm:$0xff] }
 0x282   : > { %v2809_v8 = vpop.f32.mrf.mxu0 }
 0x283   : > { %v1649_v9 = vadd.f32 1e-05, %v1648_v5  ;;  %v1805_v10 = vadd.f32 %v1804_v7, %v1803_v3 }
 0x285   : > { %3053 = vrsqrt.f32 %v1649_v9  ;;  %v1806_v11 = vrot.slane %v1805_v10, 2 }
 0x287   : > { %v1807_v12 = vadd.f32 %v1806_v11, %v1805_v10 }
 0x289   : > { %v1808_v13 = vrot.slane %v1807_v12, 1 }
 0x28b   : > { %v1809_v14 = vadd.f32 %v1808_v13, %v1807_v12 }
 0x28d   : > { %v1810_v15 = vmul.f32 0.5, %v1809_v14 }
 0x28f   : > { %v1811_v16 = vsub.f32 %v1798_v38, %v1810_v15  ;;  %v3857_v38 = vld [vmem:[#allocation4 + $0x8] sm:$0xff]  }
 0x291   : > { %v1812_v17 = vmul.f32 %v1811_v16, %v1811_v16 }
 0x292   : > { %v3054_v18 = vpop.eup %3053 }
 0x293   : > { %v1651_v20 = vmul.f32 %v3054_v18, %v1639_v61  ;;  %v1813_v21 = vmul.f32 %v3766_v47, %v1812_v17 }
 0x295   : > { %v1658_v43 = vmul.f32 %v2467_v19, %v1651_v20  ;;  %v1814_v45 = vrot.slane %v1813_v21, 4 }
 0x297   : > { %v1815_v46 = vadd.f32 %v1814_v45, %v1813_v21  ;;  %v1665_v48 = vadd.f32 %v2468_v22, %v1658_v43 }
 0x299   : > { %v1816_v49 = vrot.slane %v1815_v46, 2  ;;  %v1666_v50 = vmax.f32 %v1665_v48, 0.0 }
 0x29b   : > { %v1817_v51 = vadd.f32 %v1816_v49, %v1815_v46  ;;  %v1667_v52 = vpack.c.bf16 %v1666_v50, %v1666_v50 }
 0x29d   : > { %v1818_v53 = vrot.slane %v1817_v51, 1  ;;  %2787 = vmatmul.mubr.bf16.vlgmr.msra.gmra.mxu1 %v1667_v52 }
 0x29e   : > { %2811 = vmatpush3.bf16.msra.mxu1 %v3660_v23  ;;  %2826 = vmatprep.mubr.msk.bf16.mxu1 %vm3140_vm0, %v3139_v6 }
 0x29f   : > { %v1819_v54 = vadd.f32 %v1818_v53, %v1817_v51  ;;  %2812 = vmatprep.subr.bf16.mxu1 %v3139_v6 }
 0x2a1   : > { %v1820_v55 = vmul.f32 0.5, %v1819_v54 }
 0x2a2   : > { %2813 = vmatpush3.bf16.msra.mxu1 %v3667_v24 }
 0x2a3   : > { %v1821_v56 = vadd.f32 1e-05, %v1820_v55  ;;  %2814 = vmatprep.subr.bf16.mxu1 %v3139_v6 }
 0x2a5   : > { %3055 = vrsqrt.f32 %v1821_v56 }
 0x2a6   : > { %2815 = vmatpush3.bf16.msra.mxu1 %v3674_v25 }
 0x2a7   : > { %2816 = vmatprep.subr.bf16.mxu1 %v3139_v6 }
 0x2aa   : > { %2817 = vmatpush3.bf16.msra.mxu1 %v3681_v26 }
 0x2ab   : > { %2818 = vmatprep.subr.bf16.mxu1 %v3139_v6 }
 0x2ae   : > { %2819 = vmatpush3.bf16.msra.mxu1 %v3688_v27  ;;  %v3044_v27 = vld [vmem:[%s3926_s10] sm:$0xff]  }
 0x2af   : > { %2820 = vmatprep.subr.bf16.mxu1 %v3139_v6  ;;  %2845 = vmatpush3.bf16.msra.mxu0 %v3044_v27 }
 0x2b0   : > { %2870 = vmatprep.subr.bf16.mxu0 %v3139_v6 }
 0x2b2   : > { %v3056_v23 = vpop.eup %3055  ;;  %2821 = vmatpush3.bf16.msra.mxu1 %v3695_v28  ;;  %v2469_v28 = vld [vmem:[%s3925_s9] ss:$0 sm:$0xff] }
 0x2b3   : > { %v1823_v24 = vmul.f32 %v3056_v23, %v1811_v16  ;;  %2822 = vmatprep.subr.bf16.mxu1 %v3139_v6 }
 0x2b5   : > { %v1824_v57 = vmul.f32 %v2467_v19, %v1823_v24 }
 0x2b6   : > { %2823 = vmatpush3.bf16.msra.mxu1 %v3702_v29 }
 0x2b7   : > { %v1825_v25 = vadd.f32 %v2468_v22, %v1824_v57  ;;  %2824 = vmatprep.subr.bf16.mxu1 %v3139_v6 }
 0x2b9   : > { %v1826_v58 = vmax.f32 %v1825_v25, 0.0 }
 0x2ba   : > { %2825 = vmatpush3.bf16.msra.mxu1 %v3709_v30 }
 0x2bb   : > { %v1827_v26 = vpack.c.bf16 %v1826_v58, %v1826_v58  ;;  %2850 = vmatprep.subr.bf16.mxu1 %v3139_v6 }
 0x2bd   : > { %2827 = vmatmul.mubr.bf16.vlgmr.msra.gmra.mxu1 %v1827_v26 }
 0x2be   : > { %2866 = vmatprep.mubr.msk.bf16.mxu1 %vm3140_vm0, %v3139_v6  ;;  %2851 = vmatpush3.bf16.msra.mxu1 %v3833_v33 }
 0x2bf   : > { %2852 = vmatprep.subr.bf16.mxu1 %v3139_v6 }
 0x35d   : > { %v1756_v29 = vpop.f32.mrf.mxu1 }
 0x35e   : > { %v3805_v30 = vadd.f32 %v2469_v28, %v1756_v29 }
 0x35f   : > { %v2788_v59 = vpop.f32.mrf.mxu1 }
 0x360   : > { %v1904_v60 = vpack.c.bf16 %v3805_v30, %v3805_v30  ;;  %v2248_v61 = vmul.f32 %v3805_v30, %v3805_v30  ;;  %v2487_v59 = vld [vmem:[%s3928_s12] ss:$0 sm:$0xff] }
 0x361   : > { %v1759_v62 = vpop.f32.mrf.mxu1 }
 0x362   : > { %2249 = vadd.xlane.f32.xlu1 %v2248_v61  ;;  %2847 = vmatmul.mubr.bf16.vlgmr.msra.gmra.mxu0 %v1904_v60  ;;  %v2488_v62 = vld [vmem:[%s3929_s13] ss:$0 sm:$0xff] }
 0x363   : > { %v2789_v63 = vpop.f32.mrf.mxu1  ;;  %2871 = vmatpush3.bf16.msra.mxu0 %v3716_v31  ;;  %2886 = vmatprep.mubr.msk.bf16.mxu0 %vm3140_vm0, %v3139_v6 }
 0x364   : > { %2872 = vmatprep.subr.bf16.mxu0 %v3139_v6 }
 0x367   : > { %2873 = vmatpush3.bf16.msra.mxu0 %v3722_v32 }
 0x368   : > { %2874 = vmatprep.subr.bf16.mxu0 %v3139_v6 }
 0x36b   : > { %2875 = vmatpush3.bf16.msra.mxu0 %v3729_v39 }
 0x36c   : > { %2876 = vmatprep.subr.bf16.mxu0 %v3139_v6 }
 0x36f   : > { %2877 = vmatpush3.bf16.msra.mxu0 %v3736_v40 }
 0x370   : > { %2878 = vmatprep.subr.bf16.mxu0 %v3139_v6 }
 0x373   : > { %2879 = vmatpush3.bf16.msra.mxu0 %v3743_v41 }
 0x374   : > { %2880 = vmatprep.subr.bf16.mxu0 %v3139_v6 }
 0x377   : > { %2881 = vmatpush3.bf16.msra.mxu0 %v3750_v42 }
 0x378   : > { %2882 = vmatprep.subr.bf16.mxu0 %v3139_v6 }
 0x37b   : > { %2883 = vmatpush3.bf16.msra.mxu0 %v3757_v44  ;;  %v3837_v44 = vld [vmem:[#allocation4 + $0x30] sm:$0xff]  }
 0x37c   : > { %2884 = vmatprep.subr.bf16.mxu0 %v3139_v6  ;;  %2853 = vmatpush3.bf16.msra.mxu1 %v3837_v44 }
 0x37d   : > { %v1862_v31 = vpop.f32.mrf.mxu1  ;;  %2854 = vmatprep.subr.bf16.mxu1 %v3139_v6 }
 0x37e   : > { %v3827_v32 = vadd.f32 %v2469_v28, %v1862_v31 }
 0x37f   : > { %v2828_v39 = vpop.f32.mrf.mxu1  ;;  %2885 = vmatpush3.bf16.msra.mxu0 %v3044_v27 }
 0x380   : > { %v2130_v40 = vpack.c.bf16 %v3827_v32, %v3827_v32  ;;  %v2254_v41 = vmul.f32 %v3827_v32, %v3827_v32  ;;  %2855 = vmatpush3.bf16.msra.mxu1 %v3841_v34 }
 0x381   : > { %v1865_v0 = vpop.f32.mrf.mxu1  ;;  %2856 = vmatprep.subr.bf16.mxu1 %v3139_v6 }
 0x382   : > { %2255 = vadd.xlane.f32.xlu1 %v2254_v41  ;;  %2887 = vmatmul.mubr.bf16.vlgmr.msra.gmra.mxu0 %v2130_v40 }
 0x383   : > { %v2829_v42 = vpop.f32.mrf.mxu1 }
 0x384   : > { %2857 = vmatpush3.bf16.msra.mxu1 %v3845_v35 }
 0x385   : > { %2858 = vmatprep.subr.bf16.mxu1 %v3139_v6 }
 0x388   : > { %2859 = vmatpush3.bf16.msra.mxu1 %v3849_v36 }
 0x389   : > { %2860 = vmatprep.subr.bf16.mxu1 %v3139_v6 }
 0x38c   : > { %2861 = vmatpush3.bf16.msra.mxu1 %v3853_v37 }
 0x38d   : > { %2862 = vmatprep.subr.bf16.mxu1 %v3139_v6 }
 0x390   : > { %2863 = vmatpush3.bf16.msra.mxu1 %v3857_v38 }
 0x391   : > { %2864 = vmatprep.subr.bf16.mxu1 %v3139_v6 }
 0x394   : > { %2865 = vmatpush3.bf16.msra.mxu1 %v3861_v1 }
 0x395   : > { %2890 = vmatprep.subr.bf16.mxu1 %v3139_v6 }
 0x422   : > { %v1993_v3 = vpop.f32.mrf.mxu0 }
 0x423   : > { %v1994_v4 = vadd.f32 %v2478_v2, %v1993_v3 }
 0x424   : > { %v2848_v5 = vpop.f32.mrf.mxu0 }
 0x425   : > { %v1999_v7 = vmul.f32 %v3766_v47, %v1994_v4 }
 0x426   : > { %v1996_v8 = vpop.f32.mrf.mxu0 }
 0x427   : > { %v2000_v9 = vrot.slane %v1999_v7, 4 }
 0x428   : > { %v2849_v10 = vpop.f32.mrf.mxu0 }
 0x429   : > { %v2001_v11 = vadd.f32 %v2000_v9, %v1999_v7 }
 0x42b   : > { %v2002_v12 = vrot.slane %v2001_v11, 2 }
 0x42d   : > { %v2003_v13 = vadd.f32 %v2002_v12, %v2001_v11 }
 0x42f   : > { %v2004_v14 = vrot.slane %v2003_v13, 1 }
 0x431   : > { %v2005_v15 = vadd.f32 %v2004_v14, %v2003_v13 }
 0x433   : > { %v2006_v16 = vmul.f32 0.5, %v2005_v15 }
 0x435   : > { %v2007_v17 = vsub.f32 %v1994_v4, %v2006_v16 }
 0x437   : > { %v2008_v18 = vmul.f32 %v2007_v17, %v2007_v17 }
 0x439   : > { %v2009_v19 = vmul.f32 %v3766_v47, %v2008_v18  ;;  %v2250_v18 = vpop.xlane.xlu1 %2249 }
 0x43b   : > { %v2010_v20 = vrot.slane %v2009_v19, 4 }
 0x43d   : > { %v2011_v21 = vadd.f32 %v2010_v20, %v2009_v19  ;;  %v2256_v19 = vpop.xlane.xlu1 %2255 }
 0x43e   : > { %v2257_v20 = vmax.f32 %v2256_v19, 1e-24 }
 0x43f   : > { %v2012_v22 = vrot.slane %v2011_v21, 2 }
 0x441   : > { %v2013_v43 = vadd.f32 %v2012_v22, %v2011_v21 }
 0x442   : > { %v2165_v45 = vpop.f32.mrf.mxu0 }
 0x443   : > { %v2014_v46 = vrot.slane %v2013_v43, 1  ;;  %v2166_v48 = vadd.f32 %v2478_v2, %v2165_v45 }
 0x444   : > { %v2888_v49 = vpop.f32.mrf.mxu0 }
 0x445   : > { %v2015_v50 = vadd.f32 %v2014_v46, %v2013_v43  ;;  %v2171_v51 = vmul.f32 %v3766_v47, %v2166_v48 }
 0x446   : > { %v2168_v52 = vpop.f32.mrf.mxu0 }
 0x447   : > { %v2016_v53 = vmul.f32 0.5, %v2015_v50  ;;  %v2172_v54 = vrot.slane %v2171_v51, 4  ;;  %v2251_v50 = vmax.f32 %v2250_v18, 1e-24 }
 0x448   : > { %v2889_v55 = vpop.f32.mrf.mxu0 }
 0x449   : > { %v2017_v56 = vadd.f32 1e-05, %v2016_v53  ;;  %v2173_v23 = vadd.f32 %v2172_v54, %v2171_v51 }
 0x44b   : > { %3057 = vrsqrt.f32 %v2017_v56  ;;  %v2174_v24 = vrot.slane %v2173_v23, 2 }
 0x44d   : > { %v2175_v57 = vadd.f32 %v2174_v24, %v2173_v23 }
 0x44f   : > { %v2176_v25 = vrot.slane %v2175_v57, 1 }
 0x451   : > { %v2177_v58 = vadd.f32 %v2176_v25, %v2175_v57 }
 0x453   : > { %v2178_v26 = vmul.f32 0.5, %v2177_v58 }
 0x455   : > { %v2179_v27 = vsub.f32 %v2166_v48, %v2178_v26 }
 0x457   : > { %v2180_v28 = vmul.f32 %v2179_v27, %v2179_v27 }
 0x458   : > { %v3058_v29 = vpop.eup %3057 }
 0x459   : > { %v2019_v60 = vmul.f32 %v3058_v29, %v2007_v17  ;;  %v2181_v61 = vmul.f32 %v3766_v47, %v2180_v28 }
 0x45b   : > { %v2026_v63 = vmul.f32 %v2487_v59, %v2019_v60  ;;  %v2182_v31 = vrot.slane %v2181_v61, 4 }
 0x45d   : > { %v2183_v39 = vadd.f32 %v2182_v31, %v2181_v61  ;;  %v2033_v40 = vadd.f32 %v2488_v62, %v2026_v63 }
 0x45f   : > { %v2184_v41 = vrot.slane %v2183_v39, 2  ;;  %v2034_v0 = vmax.f32 %v2033_v40, 0.0 }
 0x461   : > { %v2185_v42 = vadd.f32 %v2184_v41, %v2183_v39  ;;  %v2035_v2 = vpack.c.bf16 %v2034_v0, %v2034_v0 }
 0x463   : > { %v2186_v3 = vrot.slane %v2185_v42, 1  ;;  %2867 = vmatmul.mubr.bf16.vlgmr.msra.gmra.mxu1 %v2035_v2 }
 0x464   : > { %2891 = vmatpush3.bf16.msra.mxu1 %v3833_v33  ;;  %2906 = vmatprep.mubr.msk.bf16.mxu1 %vm3140_vm0, %v3139_v6 }
 0x465   : > { %v2187_v4 = vadd.f32 %v2186_v3, %v2185_v42  ;;  %2892 = vmatprep.subr.bf16.mxu1 %v3139_v6 }
 0x467   : > { %v2188_v5 = vmul.f32 0.5, %v2187_v4 }
 0x468   : > { %2893 = vmatpush3.bf16.msra.mxu1 %v3837_v44 }
 0x469   : > { %v2189_v7 = vadd.f32 1e-05, %v2188_v5  ;;  %2894 = vmatprep.subr.bf16.mxu1 %v3139_v6 }
 0x46b   : > { %3059 = vrsqrt.f32 %v2189_v7 }
 0x46c   : > { %2895 = vmatpush3.bf16.msra.mxu1 %v3841_v34  ;;  %3061 = vrsqrt.f32 %v2257_v20 }
 0x46d   : > { %2896 = vmatprep.subr.bf16.mxu1 %v3139_v6 }
 0x470   : > { %2897 = vmatpush3.bf16.msra.mxu1 %v3845_v35 }
 0x471   : > { %2898 = vmatprep.subr.bf16.mxu1 %v3139_v6 }
 0x474   : > { %2899 = vmatpush3.bf16.msra.mxu1 %v3849_v36  ;;  %v2489_v36 = vld [vmem:[%s3931_s15] ss:$0 sm:$0xff] }
 0x475   : > { %2900 = vmatprep.subr.bf16.mxu1 %v3139_v6 }
 0x478   : > { %v3060_v33 = vpop.eup %3059  ;;  %2901 = vmatpush3.bf16.msra.mxu1 %v3853_v37 }
 0x479   : > { %v2191_v44 = vmul.f32 %v3060_v33, %v2179_v27  ;;  %2902 = vmatprep.subr.bf16.mxu1 %v3139_v6  ;;  %v3062_v43 = vpop.eup %3061 }
 0x47a   : > { %v2259_v48 = vmul.f32 %v3062_v43, %v3827_v32 }
 0x47b   : > { %v2192_v8 = vmul.f32 %v2487_v59, %v2191_v44 }
 0x47c   : > { %2903 = vmatpush3.bf16.msra.mxu1 %v3857_v38 }
 0x47d   : > { %2904 = vmatprep.subr.bf16.mxu1 %v3139_v6  ;;  %v2193_v34 = vadd.f32 %v2488_v62, %v2192_v8 }
 0x47f   : > { %v2194_v9 = vmax.f32 %v2193_v34, 0.0 }
 0x480   : > { %2905 = vmatpush3.bf16.msra.mxu1 %v3861_v1 }
 0x481   : > { %v2195_v35 = vpack.c.bf16 %v2194_v9, %v2194_v9 }
 0x483   : > { %2907 = vmatmul.mubr.bf16.vlgmr.msra.gmra.mxu1 %v2195_v35 }
 0x523   : > { %v2124_v10 = vpop.f32.mrf.mxu1 }
 0x524   : > { %v2125_v37 = vadd.f32 %v2489_v36, %v2124_v10 }
 0x525   : > { %v2868_v11 = vpop.f32.mrf.mxu1 }
 0x526   : > { %v2236_v12 = vmul.f32 %v2125_v37, %v2125_v37 }
 0x527   : > { %v2127_v13 = vpop.f32.mrf.mxu1 }
 0x528   : > { %2237 = vadd.xlane.f32.xlu0 %v2236_v12 }
 0x529   : > { %v2869_v14 = vpop.f32.mrf.mxu1 }
 0x543   : > { %v2230_v38 = vpop.f32.mrf.mxu1 }
 0x544   : > { %v2231_v15 = vadd.f32 %v2489_v36, %v2230_v38 }
 0x545   : > { %v2908_v6 = vpop.f32.mrf.mxu1 }
 0x546   : > { %v2242_v16 = vmul.f32 %v2231_v15, %v2231_v15 }
 0x547   : > { %v2233_v17 = vpop.f32.mrf.mxu1 }
 0x548   : > { %2243 = vadd.xlane.f32.xlu0 %v2242_v16 }
 0x549   : > { %v2909_v1 = vpop.f32.mrf.mxu1 }
 0x5b1   : > { %v2238_v21 = vpop.xlane.xlu0 %2237 }
 0x5b2   : > { %v2239_v22 = vmax.f32 %v2238_v21, 1e-24 }
 0x5b4   : > { %3063 = vrsqrt.f32 %v2239_v22 }
 0x5b5   : > { %3065 = vrsqrt.f32 %v2251_v50 }
 0x5c1   : > { %v3064_v45 = vpop.eup %3063 }
 0x5c2   : > { %v2241_v46 = vmul.f32 %v3064_v45, %v2125_v37  ;;  %v3066_v53 = vpop.eup %3065 }
 0x5c3   : > { %v2253_v56 = vmul.f32 %v3066_v53, %v3805_v30 }
 0x5c4   : > { %v2260_v49 = vmul.f32 %v2259_v48, %v2241_v46 }
 0x5c6   : > { %2261 = vadd.xlane.f32.xlu0 %v2260_v49 }
 0x5d1   : > { %v2244_v51 = vpop.xlane.xlu0 %2243 }
 0x5d2   : > { %v2245_v52 = vmax.f32 %v2244_v51, 1e-24 }
 0x5d4   : > { %3067 = vrsqrt.f32 %v2245_v52 }
 0x5e1   : > { %v3068_v54 = vpop.eup %3067 }
 0x5e2   : > { %v2247_v55 = vmul.f32 %v3068_v54, %v2231_v15 }
 0x5e4   : > { %v2265_v23 = vmul.f32 %v2253_v56, %v2247_v55 }
 0x5e6   : > { %2266 = vadd.xlane.f32.xlu1 %v2265_v23 }
 0x64f   : > { %v2262_v24 = vpop.xlane.xlu0 %2261 }
 0x650   : > { %v2263_v57 = vmul.f32 2.0, %v2262_v24 }
 0x652   : > { %v2264_v26 = vsub.f32 2.0, %v2263_v57 }
 0x66f   : > { %v2267_v25 = vpop.xlane.xlu1 %2266 }
 0x670   : > { %v2268_v58 = vmul.f32 2.0, %v2267_v25 }
 0x672   : > { %v2269_v32 = vsub.f32 2.0, %v2268_v58 }
 0x674   : > { %v2270_v27 = vadd.f32 %v2269_v32, %v2264_v26 }
 0x676   : > { %v2271_v28 = vmul.f32 %v3766_v47, %v2270_v27 }
 0x678   : > { %v2272_v29 = vrot.slane %v2271_v28, 4 }
 0x67a   : > { %v2273_v59 = vadd.f32 %v2272_v29, %v2271_v28 }
 0x67c   : > { %v2274_v60 = vrot.slane %v2273_v59, 2 }
 0x67e   : > { %v2275_v61 = vadd.f32 %v2274_v60, %v2273_v59 }
 0x680   : > { %v2276_v62 = vrot.slane %v2275_v61, 1 }
 0x682   : > { %v2277_v63 = vadd.f32 %v2276_v62, %v2275_v61 }
 0x684   : > { %v2278_v31 = vmul.f32 0.5, %v2277_v63 }
 0x686   : > { %2279 = vst [vmem:[#allocation7] sm:$0x1] %v2278_v31 }
 0x687 PF: > { %p2924_p4 = scmp.eq.s32.totalorder %s3233_s22, 1  ;;  %s3141_s27 = smov [#allocation7]  }
 0x688   : > { %s2287_s28 = sshll.u32 %s3141_s27, 4  ;;  %s2288_s28 = int_to_ptr.vmem [resolvable:$true] %s2287_s28 }
 0x689   : > { %s3095_s29 = scalar_lea.vmem %s2288_s28, 16  ;;  %s3101_s30 = scalar_lea.vmem %s2288_s28, 32 }
 0x68a   : > { %p3096_p5 = scmp.ne.s32.totalorder %s2288_s28, %s3095_s29  ;;  %p3102_p8 = scmp.lt.s32.totalorder %s2288_s28, %s2288_s28 }
 0x68b   : > { %p3103_p9 = scmp.lt.s32.totalorder %s3101_s30, %s3095_s29 }
 0x68c   : > { %p3097_p6 = pnand %p3096_p5, %p2924_p4 }
 0x68d   : > { %p3104_p10 = por %p3103_p9, %p3102_p8 }
 0x68e   : > { %p3098_p7 = pneg %p3097_p6 }
 0x690   : > { %p3105_p11 = pnand %p3104_p10, %p3098_p7 }
 0x692   : > { %3108 = shalt.err (!%p3105_p11)
}
 0x693   : > { %2915 = dma.vmem_to_hbm [thread:$0]  (%p2924_p4), %s2288_s28, 16, %s3932_s16, [#allocation6]  }
 0x694   : > { %3128 = dma.done.wait (%p2924_p4), [#allocation6], 16  }
 0x695   : > { %3130 = vsyncadd (%p2924_p4), [#allocation6], 4294967280 }
 0x696 PF: > { %s28_s21 = sadd.s32 1, %s3133_s21  }
 0x697   : > { %p25_p12 = scmp.ge.s32.totalorder %s28_s21, 4  }
 0x699   :  { %27 = sbr.rel (!%p25_p12) target bundleno = 5 (0x5), region = 130 }
 0x69e   :  { %2300 = vsyncpa [#allocation5], 1 }
 0x69f   :  { %2302 = vsyncpa [#allocation5 + $0x1], 1 }
 0x6a0   :  { %2303 = vsyncpa [#allocation6], 1 }
 0x6a1   :  { %2305 = vsyncpa [#allocation6 + $0x1], 1 }

</bundles_post_ra>
